<compile_context>
chip_gen: v5e
topology: v5e:2x2
jax: 0.10.0
libtpu: 0.0.40
codegen_flags: <defaults>
</compile_context>

<pallas_src>
import functools
import math

import jax
import jax.numpy as jnp
from jax import lax
from jax.experimental import pallas as pl
from jax.experimental.pallas import tpu as pltpu


def _split_heads(x2d, nh, hd):
    """(N, nh*hd) -> (nh, N, hd): head split + lane-preserving einshape transpose."""
    n = x2d.shape[0]
    return pltpu.einshape("nhd->hnd", x2d.reshape(n, nh, hd))


def _merge_heads(x3d):
    """(nh, N, hd) -> (N, nh*hd): lane-preserving einshape transpose + merge."""
    nh, n, hd = x3d.shape
    return pltpu.einshape("hnd->nhd", x3d).reshape(n, nh * hd)


def _mha_kernel(q_ref, k_ref, v_ref,
                wq_ref, bq_ref, wk_ref, bk_ref, wv_ref, bv_ref,
                wo_ref, bo_ref,
                out_ref,
                k_sc, v_sc,
                *, num_heads, head_size):
    f32, bf16 = jnp.float32, jnp.bfloat16
    nh, hd = num_heads, head_size

    def project(x_bf16, w_ref):
        # y = x @ W.T without materializing the transpose (contract last dims).
        return lax.dot_general(x_bf16, w_ref[...],
                               dimension_numbers=(((1,), (1,)), ((), ())),
                               preferred_element_type=f32)

    # ---- K / V projections: once per batch element (first q tile), cached ----
    # head-major in VMEM scratch so later q tiles reuse them.
    # TODO(synk): for very long sequences, hoist this into its own pass (or add
    #             a KV tile axis with online softmax) so the qi==0 step does
    #             not carry the full-sequence projection bubble and VMEM stays
    #             O(TQ*TK) instead of O(S).
    @pl.when(pl.program_id(1) == 0)
    def _():
        mk = project(k_ref[...], wk_ref) + bk_ref[...]           # (S, H) f32
        mv = project(v_ref[...], wv_ref) + bv_ref[...]           # (S, H) f32
        k_sc[...] = _split_heads(mk.astype(bf16), nh, hd)        # (nh, S, hd)
        v_sc[...] = _split_heads(mv.astype(bf16), nh, hd)        # (nh, S, hd)

    # ---- Q projection (1/sqrt(hd) pre-folded into Wq/bq), head-major split ---
    mq = project(q_ref[...], wq_ref) + bq_ref[...]               # (TQ, H) f32
    qh = _split_heads(mq.astype(bf16), nh, hd)                   # (nh, TQ, hd)

    # ---- Attention, batched over heads (head axis leading on all operands) --
    scores = jnp.einsum('hqd,hkd->hqk', qh, k_sc[...],
                        preferred_element_type=f32)              # (nh, TQ, S)

    # Numerically-stable softmax, kept in f32 (approx reciprocal -> EUP slot).
    m = jnp.max(scores, axis=-1, keepdims=True)
    e = jnp.exp(scores - m)
    denom = jnp.sum(e, axis=-1, keepdims=True)
    probs = (e * pl.reciprocal(denom, approx=True)).astype(bf16)  # (nh, TQ, S)
    # TODO(synk): attention_mask ((1.0 - mask) * -10000 added to scores) is not
    #             implemented; the reference call path uses attention_mask=None.
    # Dropout is identity in eval mode.

    ctx = jnp.einsum('hqk,hkd->hqd', probs, v_sc[...],
                     preferred_element_type=f32)                 # (nh, TQ, hd)

    # ---- Output projection: single lane-dense matmul, full-H contraction ----
    ctx_flat = _merge_heads(ctx.astype(bf16))                    # (TQ, H) bf16
    out = project(ctx_flat, wo_ref) + bo_ref[...]                # (TQ, H) f32
    out_ref[...] = out.astype(out_ref.dtype)


def multi_head_attention(query, key, value, params, *, num_heads,
                         attention_scale=True, block_q=256):
    """Pallas MHA forward.  query/key/value: (B, S, H)."""
    B, S, H = query.shape
    assert H % num_heads == 0
    nh = num_heads
    hd = H // nh

    block_q = min(block_q, S)
    assert S % block_q == 0, "seq_len must be divisible by block_q"
    num_q_tiles = S // block_q

    wq, bq, wk, bk, wv, bv, wo, bo = params
    bf16, f32 = jnp.bfloat16, jnp.float32

    # Fold the 1/sqrt(head_dim) attention scale into the query projection.
    scale = (1.0 / math.sqrt(hd)) if attention_scale else 1.0

    # bf16 activations + MXU operands (halves HBM DMA bytes and VMEM blocks);
    # accumulation stays f32 in-kernel.  wo keeps its original (H,H) layout.
    q_in, k_in, v_in = (x.astype(bf16) for x in (query, key, value))
    wq_c = (wq * scale).astype(bf16)
    wk_c, wv_c, wo_c = (w.astype(bf16) for w in (wk, wv, wo))
    bq2 = (bq * scale).reshape(1, H).astype(f32)
    bk2, bv2, bo2 = (b.reshape(1, H).astype(f32) for b in (bk, bv, bo))

    q_spec = pl.BlockSpec((pl.Squeezed(), block_q, H), lambda b, qi: (b, qi, 0))
    kv_spec = pl.BlockSpec((pl.Squeezed(), S, H), lambda b, qi: (b, 0, 0))
    w_spec = pl.BlockSpec((H, H), lambda b, qi: (0, 0))
    b_spec = pl.BlockSpec((1, H), lambda b, qi: (0, 0))
    out_spec = pl.BlockSpec((pl.Squeezed(), block_q, H), lambda b, qi: (b, qi, 0))
    # TODO(synk): weights/biases have grid-constant index maps; on JAX versions
    #             with BlockSpec pipeline_mode support, pl.Buffered(1) on the
    #             weight specs saves one extra VMEM copy of each (H,H) slab.

    kernel = functools.partial(_mha_kernel, num_heads=nh, head_size=hd)

    return pl.pallas_call(
        kernel,
        out_shape=jax.ShapeDtypeStruct((B, S, H), query.dtype),
        grid_spec=pltpu.PrefetchScalarGridSpec(
            num_scalar_prefetch=0,
            grid=(B, num_q_tiles),
            in_specs=[q_spec, kv_spec, kv_spec,      # q, k, v inputs (bf16)
                      w_spec, b_spec,                # q projection
                      w_spec, b_spec,                # k projection
                      w_spec, b_spec,                # v projection
                      w_spec, b_spec],               # output projection
            out_specs=out_spec,
            scratch_shapes=[pltpu.VMEM((nh, S, hd), bf16),   # cached K projection
                            pltpu.VMEM((nh, S, hd), bf16)],  # cached V projection
        ),
        compiler_params=pltpu.CompilerParams(
            # q-tile axis is "arbitrary": K/V projections cached at qi==0 are
            # reused (sequentially) by later q tiles of the same batch element.
            dimension_semantics=("parallel", "arbitrary"),
            vmem_limit_bytes=40 * 1024 * 1024),
    )(q_in, k_in, v_in, wq_c, bq2, wk_c, bk2, wv_c, bv2, wo_c, bo2)


def _init_linear(key, out_features, in_features):
    # Deterministic init mimicking nn.Linear's default (uniform +/- 1/sqrt(fan_in)).
    kw, kb = jax.random.split(key)
    bound = 1.0 / math.sqrt(in_features)
    w = jax.random.uniform(kw, (out_features, in_features), jnp.float32,
                           minval=-bound, maxval=bound)
    b = jax.random.uniform(kb, (out_features,), jnp.float32,
                           minval=-bound, maxval=bound)
    return w, b


def _reference_mha(query, key, value, params, *, num_heads, attention_scale=True):
    """Pure-JAX f32 reference mirroring the PyTorch forward (eval, no mask)."""
    wq, bq, wk, bk, wv, bv, wo, bo = params
    B, S, H = query.shape
    hd = H // num_heads

    def split_heads(x):
        return x.reshape(B, S, num_heads, hd).transpose(0, 2, 1, 3)

    q = split_heads(query @ wq.T + bq)
    k = split_heads(key @ wk.T + bk)
    v = split_heads(value @ wv.T + bv)
    scores = jnp.einsum('bhqd,bhkd->bhqk', q, k)
    if attention_scale:
        scores = scores / math.sqrt(hd)
    probs = jax.nn.softmax(scores, axis=-1)
    ctx = jnp.einsum('bhqk,bhkd->bhqd', probs, v)
    ctx = ctx.transpose(0, 2, 1, 3).reshape(B, S, H)
    return ctx @ wo.T + bo


if __name__ == "__main__":
    B, S, H = 2, 16, 32
    num_heads = 4

    root = jax.random.PRNGKey(0)
    kq_in, kk_in, kv_in, k_wq, k_wk, k_wv, k_wo = jax.random.split(root, 7)

    query = jax.random.normal(kq_in, (B, S, H), jnp.float32)
    key = jax.random.normal(kk_in, (B, S, H), jnp.float32)
    value = jax.random.normal(kv_in, (B, S, H), jnp.float32)

    wq, bq = _init_linear(k_wq, H, H)
    wk, bk = _init_linear(k_wk, H, H)
    wv, bv = _init_linear(k_wv, H, H)
    wo, bo = _init_linear(k_wo, H, H)
    params = (wq, bq, wk, bk, wv, bv, wo, bo)

    out = multi_head_attention(query, key, value, params,
                               num_heads=num_heads, attention_scale=True,
                               block_q=8)   # 2 q-tiles per batch element
    out = jax.block_until_ready(out)

    ref = _reference_mha(query, key, value, params,
                         num_heads=num_heads, attention_scale=True)
    assert out.shape == (B, S, H)
    # bf16 activations/MXU operands with f32 accumulation -> looser tolerance.
    assert jnp.allclose(out, ref, atol=5e-2, rtol=5e-2), "mismatch vs reference"

    print("KERNEL_OK")
</pallas_src>

<mosaic_0001>
module attributes {stable_mosaic.version = 11 : i64} {
  func.func @_mha_kernel(%arg0: i32, %arg1: i32, %arg2: memref<1x8x32xbf16, #tpu.memory_space<vmem>>, %arg3: memref<1x16x32xbf16, #tpu.memory_space<vmem>>, %arg4: memref<1x16x32xbf16, #tpu.memory_space<vmem>>, %arg5: memref<32x32xbf16, #tpu.memory_space<vmem>>, %arg6: memref<1x32xf32, #tpu.memory_space<vmem>>, %arg7: memref<32x32xbf16, #tpu.memory_space<vmem>>, %arg8: memref<1x32xf32, #tpu.memory_space<vmem>>, %arg9: memref<32x32xbf16, #tpu.memory_space<vmem>>, %arg10: memref<1x32xf32, #tpu.memory_space<vmem>>, %arg11: memref<32x32xbf16, #tpu.memory_space<vmem>>, %arg12: memref<1x32xf32, #tpu.memory_space<vmem>>, %arg13: memref<1x8x32xf32, #tpu.memory_space<vmem>>, %arg14: memref<4x16x8xbf16, #tpu.memory_space<vmem>>, %arg15: memref<4x16x8xbf16, #tpu.memory_space<vmem>>) attributes {dimension_semantics = [#tpu.dimension_semantics<parallel>, #tpu.dimension_semantics<arbitrary>], iteration_bounds = array<i64: 2, 2>, scalar_prefetch = 0 : i64, scratch_operands = 2 : i64, tpu.core_type = #tpu.core_type<tc>, window_params = [{transform_indices = @transform_0, window_bounds = array<i64: 1, 8, 32>}, {transform_indices = @transform_1, window_bounds = array<i64: 1, 16, 32>}, {transform_indices = @transform_2, window_bounds = array<i64: 1, 16, 32>}, {pipeline_mode = #tpu.pipeline_mode<synchronous>, transform_indices = @transform_3, window_bounds = array<i64: 32, 32>}, {pipeline_mode = #tpu.pipeline_mode<synchronous>, transform_indices = @transform_4, window_bounds = array<i64: 1, 32>}, {pipeline_mode = #tpu.pipeline_mode<synchronous>, transform_indices = @transform_5, window_bounds = array<i64: 32, 32>}, {pipeline_mode = #tpu.pipeline_mode<synchronous>, transform_indices = @transform_6, window_bounds = array<i64: 1, 32>}, {pipeline_mode = #tpu.pipeline_mode<synchronous>, transform_indices = @transform_7, window_bounds = array<i64: 32, 32>}, {pipeline_mode = #tpu.pipeline_mode<synchronous>, transform_indices = @transform_8, window_bounds = array<i64: 1, 32>}, {pipeline_mode = #tpu.pipeline_mode<synchronous>, transform_indices = @transform_9, window_bounds = array<i64: 32, 32>}, {pipeline_mode = #tpu.pipeline_mode<synchronous>, transform_indices = @transform_10, window_bounds = array<i64: 1, 32>}, {transform_indices = @transform_11, window_bounds = array<i64: 1, 8, 32>}]} {
    %c0_i32 = arith.constant 0 : i32
    %0 = arith.cmpi eq, %arg1, %c0_i32 : i32
    %1 = arith.extui %0 : i1 to i32
    %c0_i32_0 = arith.constant 0 : i32
    %2 = arith.cmpi ne, %1, %c0_i32_0 : i32
    scf.if %2 {
      %c0_25 = arith.constant 0 : index
      %c0_26 = arith.constant 0 : index
      %c0_27 = arith.constant 0 : index
      %39 = vector.load %arg3[%c0_25, %c0_26, %c0_27] : memref<1x16x32xbf16, #tpu.memory_space<vmem>>, vector<1x16x32xbf16>
      %40 = vector.shape_cast %39 : vector<1x16x32xbf16> to vector<16x32xbf16>
      %c0_28 = arith.constant 0 : index
      %c0_29 = arith.constant 0 : index
      %41 = vector.load %arg7[%c0_28, %c0_29] : memref<32x32xbf16, #tpu.memory_space<vmem>>, vector<32x32xbf16>
      %cst_30 = arith.constant dense<0.000000e+00> : vector<16x32xf32>
      %42 = tpu.matmul %40, %41, %cst_30 {dimension_numbers = #tpu.dot_dimension_numbers<[1], [1], [0], [0], [0, 0, 1, 0], [], []>} : vector<16x32xbf16>, vector<32x32xbf16>, vector<16x32xf32> -> vector<16x32xf32>
      %c0_31 = arith.constant 0 : index
      %c0_32 = arith.constant 0 : index
      %43 = vector.load %arg8[%c0_31, %c0_32] : memref<1x32xf32, #tpu.memory_space<vmem>>, vector<1x32xf32>
      %44 = vector.broadcast %43 : vector<1x32xf32> to vector<16x32xf32>
      %45 = arith.addf %42, %44 : vector<16x32xf32>
      %c0_33 = arith.constant 0 : index
      %c0_34 = arith.constant 0 : index
      %c0_35 = arith.constant 0 : index
      %46 = vector.load %arg4[%c0_33, %c0_34, %c0_35] : memref<1x16x32xbf16, #tpu.memory_space<vmem>>, vector<1x16x32xbf16>
      %47 = vector.shape_cast %46 : vector<1x16x32xbf16> to vector<16x32xbf16>
      %c0_36 = arith.constant 0 : index
      %c0_37 = arith.constant 0 : index
      %48 = vector.load %arg9[%c0_36, %c0_37] : memref<32x32xbf16, #tpu.memory_space<vmem>>, vector<32x32xbf16>
      %cst_38 = arith.constant dense<0.000000e+00> : vector<16x32xf32>
      %49 = tpu.matmul %47, %48, %cst_38 {dimension_numbers = #tpu.dot_dimension_numbers<[1], [1], [0], [0], [0, 0, 1, 0], [], []>} : vector<16x32xbf16>, vector<32x32xbf16>, vector<16x32xf32> -> vector<16x32xf32>
      %c0_39 = arith.constant 0 : index
      %c0_40 = arith.constant 0 : index
      %50 = vector.load %arg10[%c0_39, %c0_40] : memref<1x32xf32, #tpu.memory_space<vmem>>, vector<1x32xf32>
      %51 = vector.broadcast %50 : vector<1x32xf32> to vector<16x32xf32>
      %52 = arith.addf %49, %51 : vector<16x32xf32>
      %53 = arith.truncf %45 : vector<16x32xf32> to vector<16x32xbf16>
      %54 = vector.shape_cast %53 : vector<16x32xbf16> to vector<16x4x8xbf16>
      %55 = tpu.transpose %54, [1, 0, 2] : vector<16x4x8xbf16> -> vector<4x16x8xbf16>
      %c0_41 = arith.constant 0 : index
      %c0_42 = arith.constant 0 : index
      %c0_43 = arith.constant 0 : index
      %56 = vector.load %arg14[%c0_41, %c0_42, %c0_43] : memref<4x16x8xbf16, #tpu.memory_space<vmem>>, vector<4x16x8xbf16>
      tpu.vector_store %arg14[%c0_41, %c0_42, %c0_43], %55 {strides = array<i32>} : memref<4x16x8xbf16, #tpu.memory_space<vmem>>, vector<4x16x8xbf16>,
      %57 = arith.truncf %52 : vector<16x32xf32> to vector<16x32xbf16>
      %58 = vector.shape_cast %57 : vector<16x32xbf16> to vector<16x4x8xbf16>
      %59 = tpu.transpose %58, [1, 0, 2] : vector<16x4x8xbf16> -> vector<4x16x8xbf16>
      %c0_44 = arith.constant 0 : index
      %c0_45 = arith.constant 0 : index
      %c0_46 = arith.constant 0 : index
      %60 = vector.load %arg15[%c0_44, %c0_45, %c0_46] : memref<4x16x8xbf16, #tpu.memory_space<vmem>>, vector<4x16x8xbf16>
      tpu.vector_store %arg15[%c0_44, %c0_45, %c0_46], %59 {strides = array<i32>} : memref<4x16x8xbf16, #tpu.memory_space<vmem>>, vector<4x16x8xbf16>,
    } else {
    }
    %c0 = arith.constant 0 : index
    %c0_1 = arith.constant 0 : index
    %c0_2 = arith.constant 0 : index
    %3 = vector.load %arg2[%c0, %c0_1, %c0_2] : memref<1x8x32xbf16, #tpu.memory_space<vmem>>, vector<1x8x32xbf16>
    %4 = vector.shape_cast %3 : vector<1x8x32xbf16> to vector<8x32xbf16>
    %c0_3 = arith.constant 0 : index
    %c0_4 = arith.constant 0 : index
    %5 = vector.load %arg5[%c0_3, %c0_4] : memref<32x32xbf16, #tpu.memory_space<vmem>>, vector<32x32xbf16>
    %cst = arith.constant dense<0.000000e+00> : vector<8x32xf32>
    %6 = tpu.matmul %4, %5, %cst {dimension_numbers = #tpu.dot_dimension_numbers<[1], [1], [0], [0], [0, 0, 1, 0], [], []>} : vector<8x32xbf16>, vector<32x32xbf16>, vector<8x32xf32> -> vector<8x32xf32>
    %c0_5 = arith.constant 0 : index
    %c0_6 = arith.constant 0 : index
    %7 = vector.load %arg6[%c0_5, %c0_6] : memref<1x32xf32, #tpu.memory_space<vmem>>, vector<1x32xf32>
    %8 = vector.broadcast %7 : vector<1x32xf32> to vector<8x32xf32>
    %9 = arith.addf %6, %8 : vector<8x32xf32>
    %10 = arith.truncf %9 : vector<8x32xf32> to vector<8x32xbf16>
    %11 = vector.shape_cast %10 : vector<8x32xbf16> to vector<8x4x8xbf16>
    %12 = tpu.transpose %11, [1, 0, 2] : vector<8x4x8xbf16> -> vector<4x8x8xbf16>
    %c0_7 = arith.constant 0 : index
    %c0_8 = arith.constant 0 : index
    %c0_9 = arith.constant 0 : index
    %13 = vector.load %arg14[%c0_7, %c0_8, %c0_9] : memref<4x16x8xbf16, #tpu.memory_space<vmem>>, vector<4x16x8xbf16>
    "tpu.trace_start"() <{level = 10 : i32, message = "hqd,hkd->hqk"}> : () -> ()
    %cst_10 = arith.constant dense<0.000000e+00> : vector<4x8x16xf32>
    %14 = tpu.matmul %12, %13, %cst_10 {dimension_numbers = #tpu.dot_dimension_numbers<[2], [2], [1], [1], [0, 0, 0, 1, 1, 1], [0], [0]>} : vector<4x8x8xbf16>, vector<4x16x8xbf16>, vector<4x8x16xf32> -> vector<4x8x16xf32>
    "tpu.trace_stop"() : () -> ()
    %cst_11 = arith.constant dense<0xFF800000> : vector<4x8xf32>
    %15 = vector.multi_reduction <maximumf>, %14, %cst_11 [2] : vector<4x8x16xf32> to vector<4x8xf32>
    %16 = vector.shape_cast %15 : vector<4x8xf32> to vector<4x8x1xf32>
    %17 = vector.broadcast %16 : vector<4x8x1xf32> to vector<4x8x16xf32>
    %18 = arith.subf %14, %17 : vector<4x8x16xf32>
    %19 = math.exp %18 : vector<4x8x16xf32>
    %cst_12 = arith.constant dense<0.000000e+00> : vector<4x8xf32>
    %20 = vector.multi_reduction <add>, %19, %cst_12 [2] : vector<4x8x16xf32> to vector<4x8xf32>
    %21 = vector.shape_cast %20 : vector<4x8xf32> to vector<4x8x1xf32>
    %22 = tpu.reciprocal %21 {approx = true} : vector<4x8x1xf32> -> vector<4x8x1xf32>
    %23 = vector.broadcast %22 : vector<4x8x1xf32> to vector<4x8x16xf32>
    %24 = arith.mulf %19, %23 : vector<4x8x16xf32>
    %25 = arith.truncf %24 : vector<4x8x16xf32> to vector<4x8x16xbf16>
    %c0_13 = arith.constant 0 : index
    %c0_14 = arith.constant 0 : index
    %c0_15 = arith.constant 0 : index
    %26 = vector.load %arg15[%c0_13, %c0_14, %c0_15] : memref<4x16x8xbf16, #tpu.memory_space<vmem>>, vector<4x16x8xbf16>
    "tpu.trace_start"() <{level = 10 : i32, message = "hqk,hkd->hqd"}> : () -> ()
    %cst_16 = arith.constant dense<0.000000e+00> : vector<4x8x8xf32>
    %27 = tpu.matmul %25, %26, %cst_16 {dimension_numbers = #tpu.dot_dimension_numbers<[2], [1], [1], [2], [0, 0, 0, 1, 1, 2], [0], [0]>} : vector<4x8x16xbf16>, vector<4x16x8xbf16>, vector<4x8x8xf32> -> vector<4x8x8xf32>
    "tpu.trace_stop"() : () -> ()
    %28 = arith.truncf %27 : vector<4x8x8xf32> to vector<4x8x8xbf16>
    %29 = tpu.transpose %28, [1, 0, 2] : vector<4x8x8xbf16> -> vector<8x4x8xbf16>
    %30 = vector.shape_cast %29 : vector<8x4x8xbf16> to vector<8x32xbf16>
    %c0_17 = arith.constant 0 : index
    %c0_18 = arith.constant 0 : index
    %31 = vector.load %arg11[%c0_17, %c0_18] : memref<32x32xbf16, #tpu.memory_space<vmem>>, vector<32x32xbf16>
    %cst_19 = arith.constant dense<0.000000e+00> : vector<8x32xf32>
    %32 = tpu.matmul %30, %31, %cst_19 {dimension_numbers = #tpu.dot_dimension_numbers<[1], [1], [0], [0], [0, 0, 1, 0], [], []>} : vector<8x32xbf16>, vector<32x32xbf16>, vector<8x32xf32> -> vector<8x32xf32>
    %c0_20 = arith.constant 0 : index
    %c0_21 = arith.constant 0 : index
    %33 = vector.load %arg12[%c0_20, %c0_21] : memref<1x32xf32, #tpu.memory_space<vmem>>, vector<1x32xf32>
    %34 = vector.broadcast %33 : vector<1x32xf32> to vector<8x32xf32>
    %35 = arith.addf %32, %34 : vector<8x32xf32>
    %c0_22 = arith.constant 0 : index
    %c0_23 = arith.constant 0 : index
    %c0_24 = arith.constant 0 : index
    %36 = vector.load %arg13[%c0_22, %c0_23, %c0_24] : memref<1x8x32xf32, #tpu.memory_space<vmem>>, vector<1x8x32xf32>
    %37 = vector.shape_cast %36 : vector<1x8x32xf32> to vector<8x32xf32>
    %38 = vector.shape_cast %35 : vector<8x32xf32> to vector<1x8x32xf32>
    tpu.vector_store %arg13[%c0_22, %c0_23, %c0_24], %38 {strides = array<i32>} : memref<1x8x32xf32, #tpu.memory_space<vmem>>, vector<1x8x32xf32>,
    return
  }
  func.func @transform_0(%arg0: i32, %arg1: i32) -> (i32, i32, i32) {
    %c0_i32 = arith.constant 0 : i32
    %c0_i32_0 = arith.constant 0 : i32
    return %arg0, %arg1, %c0_i32 : i32, i32, i32
  }
  func.func @transform_1(%arg0: i32, %arg1: i32) -> (i32, i32, i32) {
    %c0_i32 = arith.constant 0 : i32
    %c0_i32_0 = arith.constant 0 : i32
    %c0_i32_1 = arith.constant 0 : i32
    return %arg0, %c0_i32, %c0_i32_0 : i32, i32, i32
  }
  func.func @transform_2(%arg0: i32, %arg1: i32) -> (i32, i32, i32) {
    %c0_i32 = arith.constant 0 : i32
    %c0_i32_0 = arith.constant 0 : i32
    %c0_i32_1 = arith.constant 0 : i32
    return %arg0, %c0_i32, %c0_i32_0 : i32, i32, i32
  }
  func.func @transform_3(%arg0: i32, %arg1: i32) -> (i32, i32) {
    %c0_i32 = arith.constant 0 : i32
    %c0_i32_0 = arith.constant 0 : i32
    %c0_i32_1 = arith.constant 0 : i32
    return %c0_i32, %c0_i32_0 : i32, i32
  }
  func.func @transform_4(%arg0: i32, %arg1: i32) -> (i32, i32) {
    %c0_i32 = arith.constant 0 : i32
    %c0_i32_0 = arith.constant 0 : i32
    %c0_i32_1 = arith.constant 0 : i32
    return %c0_i32, %c0_i32_0 : i32, i32
  }
  func.func @transform_5(%arg0: i32, %arg1: i32) -> (i32, i32) {
    %c0_i32 = arith.constant 0 : i32
    %c0_i32_0 = arith.constant 0 : i32
    %c0_i32_1 = arith.constant 0 : i32
    return %c0_i32, %c0_i32_0 : i32, i32
  }
  func.func @transform_6(%arg0: i32, %arg1: i32) -> (i32, i32) {
    %c0_i32 = arith.constant 0 : i32
    %c0_i32_0 = arith.constant 0 : i32
    %c0_i32_1 = arith.constant 0 : i32
    return %c0_i32, %c0_i32_0 : i32, i32
  }
  func.func @transform_7(%arg0: i32, %arg1: i32) -> (i32, i32) {
    %c0_i32 = arith.constant 0 : i32
    %c0_i32_0 = arith.constant 0 : i32
    %c0_i32_1 = arith.constant 0 : i32
    return %c0_i32, %c0_i32_0 : i32, i32
  }
  func.func @transform_8(%arg0: i32, %arg1: i32) -> (i32, i32) {
    %c0_i32 = arith.constant 0 : i32
    %c0_i32_0 = arith.constant 0 : i32
    %c0_i32_1 = arith.constant 0 : i32
    return %c0_i32, %c0_i32_0 : i32, i32
  }
  func.func @transform_9(%arg0: i32, %arg1: i32) -> (i32, i32) {
    %c0_i32 = arith.constant 0 : i32
    %c0_i32_0 = arith.constant 0 : i32
    %c0_i32_1 = arith.constant 0 : i32
    return %c0_i32, %c0_i32_0 : i32, i32
  }
  func.func @transform_10(%arg0: i32, %arg1: i32) -> (i32, i32) {
    %c0_i32 = arith.constant 0 : i32
    %c0_i32_0 = arith.constant 0 : i32
    %c0_i32_1 = arith.constant 0 : i32
    return %c0_i32, %c0_i32_0 : i32, i32
  }
  func.func @transform_11(%arg0: i32, %arg1: i32) -> (i32, i32, i32) {
    %c0_i32 = arith.constant 0 : i32
    %c0_i32_0 = arith.constant 0 : i32
    return %arg0, %arg1, %c0_i32 : i32, i32, i32
  }
}

</mosaic_0001>

<bundles_post_ra>
// kernel: tpu_custom_call.1
= control target key start
LH: loop header
LB: loop body
LE: loop exit
PB: predicated region body
PF: predicated region fallthrough
CT: control target
= control target key end

     0   :  { %s3307_s0 = inlined_call_operand.hbm [shape: bf16[2,16,32], index: 0, kind: input, shape index: {}]   ;;  %s3308_s1 = inlined_call_operand.hbm [shape: bf16[2,16,32], index: 1, kind: input, shape index: {}]   ;;  %s3309_s2 = inlined_call_operand.hbm [shape: bf16[2,16,32], index: 2, kind: input, shape index: {}]   ;;  %s3310_s3 = inlined_call_operand.hbm [shape: bf16[32,32], index: 3, kind: input, shape index: {}]   ;;  %s3311_s4 = inlined_call_operand.vmem [shape: f32[1,32], index: 4, kind: input, shape index: {}]   ;;  %s3312_s5 = inlined_call_operand.hbm [shape: bf16[32,32], index: 5, kind: input, shape index: {}]   ;;  %s3313_s6 = inlined_call_operand.vmem [shape: f32[1,32], index: 6, kind: input, shape index: {}]   ;;  %s3314_s7 = inlined_call_operand.hbm [shape: bf16[32,32], index: 7, kind: input, shape index: {}]   ;;  %s3315_s8 = inlined_call_operand.vmem [shape: f32[1,32], index: 8, kind: input, shape index: {}]   ;;  %s3316_s9 = inlined_call_operand.hbm [shape: bf16[32,32], index: 9, kind: input, shape index: {}]   ;;  %s3317_s10 = inlined_call_operand.vmem [shape: f32[1,32], index: 10, kind: input, shape index: {}]   ;;  %s3318_s11 = inlined_call_operand.hbm [shape: f32[2,16,32], index: 11, kind: output, shape index: {}]  }
   0x1   :  { %3336 = sst [smem:[#allocation32_spill]] %s3308_s1 }
   0x2   :  { %3337 = sst [smem:[#allocation33_spill]] %s3309_s2 }
   0x3   :  { %3338 = sst [smem:[#allocation34_spill]] %s3310_s3 }
   0x4   :  { %3339 = sst [smem:[#allocation35_spill]] %s3311_s4 }
   0x5   :  { %3340 = sst [smem:[#allocation36_spill]] %s3312_s5 }
   0x6   :  { %3341 = sst [smem:[#allocation37_spill]] %s3313_s6 }
   0x7   :  { %3342 = sst [smem:[#allocation38_spill]] %s3314_s7 }
   0x8   :  { %3343 = sst [smem:[#allocation39_spill]] %s3315_s8 }
   0x9   :  { %3344 = sst [smem:[#allocation40_spill]] %s3316_s9 }
   0xa   :  { %3345 = sst [smem:[#allocation41_spill]] %s3317_s10 }
   0xb   :  { %3346 = sst [smem:[#allocation42_spill]] %s3318_s11 }
   0xc   :  { %16 = vsyncpa [#allocation5], 0 }
   0xd   :  { %18 = vsyncpa [#allocation5 + $0x1], 0 }
   0xe   :  { %19 = vsyncpa [#allocation8], 0 }
   0xf   :  { %21 = vsyncpa [#allocation8 + $0x1], 0 }
  0x10   :  { %22 = vsyncpa [#allocation11], 0 }
  0x11   :  { %23 = vsyncpa [#allocation14], 0 }
  0x12   :  { %24 = vsyncpa [#allocation6], 0 }
  0x13   :  { %26 = vsyncpa [#allocation6 + $0x1], 0  ;;  %s2719_s17 = smov 0   ;;  %s2721_s18 = smov 0  }
  0x14   :  { %s2723_s19 = smov 0   ;;  %s2725_s20 = smov 0  }
  0x15   :  { %s2727_s21 = smov 0   ;;  %s2729_s22 = smov 0  }
  0x16   :  { %s2731_s23 = smov 0   ;;  %s2733_s24 = smov 0  }
  0x17   :  { %s2735_s25 = smov 0   ;;  %s2737_s26 = smov 0  }
  0x18   :  { %s2739_s27 = smov 0  }
  0x19 LB: > { %3347 = sst [smem:[#allocation22_spill]] %s2602_s18  ;;  %s2775_s28 = sadd.s32 4294967295, %s2638_s27   ;;  %s2638_s27 = sphi %s2739_s27, %s32_s27   ;;  %s2634_s26 = sphi %s2737_s26, %s3400_s26   ;;  %s2630_s25 = sphi %s2735_s25, %s3399_s25   ;;  %s2626_s24 = sphi %s2733_s24, %s3398_s24   ;;  %s2622_s23 = sphi %s2731_s23, %s3397_s23   ;;  %s2618_s22 = sphi %s2729_s22, %s3396_s22   ;;  %s2614_s21 = sphi %s2727_s21, %s3395_s21   ;;  %s2610_s20 = sphi %s2725_s20, %s3394_s20   ;;  %s2606_s19 = sphi %s2723_s19, %s3393_s19   ;;  %s2602_s18 = sphi %s2721_s18, %s3392_s18   ;;  %s2598_s17 = sphi %s2719_s17, %s3389_s17  }
  0x1a   : > { %3348 = sst [smem:[#allocation23_spill]] %s2610_s20  ;;  %p1972_p0 = scmp.ge.s32.totalorder %s2638_s27, 1 }
  0x1b   : > { %3349 = sst [smem:[#allocation24_spill]] %s2622_s23  ;;  %p67_p1 = scmp.eq.s32.totalorder %s2775_s28, 0 }
  0x1c   : > { %3350 = sst [smem:[#allocation25_spill]] %s2626_s24  ;;  %p325_p2 = scmp.lt.s32.totalorder %s2638_s27, 5 }
  0x1d   : > { %3351 = sst [smem:[#allocation26_spill]] %s2775_s28  ;;  %s2640_s14 = smov [#allocation10]  }
  0x1e   : > { %s3352_s3 = sld [smem:[#allocation34_spill]]  ;;  %p2783_p3 = pnand %p1972_p0, %p325_p2 }
  0x1f   : > { %s338_s15 = sshll.u32 %s2640_s14, 4  ;;  %s3355_s7 = sld [smem:[#allocation38_spill]]  ;;  %s339_s15 = int_to_ptr.vmem [resolvable:$true] %s338_s15 }
  0x20   : > { %p2130_p4 = pneg %p2783_p3  ;;  %s3320_s10 = smov 64  }
  0x21   : > { %s3322_s14 = smov 4   ;;  %s2643_s11 = smov [#allocation13]  }
  0x22   : > { %p2791_p5 = pnand %p2130_p4, %p67_p1  ;;  %s372_s24 = sshll.u32 %s2643_s11, 4  ;;  %s373_s24 = int_to_ptr.vmem [resolvable:$true] %s372_s24 }
  0x23   : > { %p61_p6 = scmp.eq.s32.totalorder %s2638_s27, 0  ;;  %p86_p7 = scmp.ne.s32.totalorder %s2606_s19, %s2602_s18 }
  0x24   : > { %s336_s12 = sshll.u32 %s3352_s3, 4  ;;  %p92_p8 = scmp.ne.s32.totalorder %s2602_s18, %s2598_s17  ;;  %s337_s12 = int_to_ptr.hbm [resolvable:$true] %s336_s12 }
  0x25   : > { %s370_s3 = sshll.u32 %s3355_s7, 4  ;;  %p3326_p9 = scmp.lt.s32.totalorder %s2638_s27, 4  ;;  %s371_s3 = int_to_ptr.hbm [resolvable:$true] %s370_s3 }
  0x26   : > { %2133 = dma.hbm_to_vmem [thread:$0]  (!%p2791_p5), %s337_s12, 256, %s339_s15, [#allocation11], %s3320_s10, %s3320_s10, %s3322_s14  }
  0x27   : > { %2139 = dma.hbm_to_vmem [thread:$0]  (!%p2791_p5), %s371_s3, 256, %s373_s24, [#allocation14], %s3320_s10, %s3320_s10, %s3322_s14  }
  0x28   : > { %p2817_p10 = por %p92_p8, %p67_p1  ;;  %s427_s12 = sand.u32 1, %s2638_s27  }
  0x29   : > { %p88_p11 = por %p86_p7, %p61_p6  ;;  %s429_s11 = sand.u32 1, %s2606_s19  }
  0x2a   : > { %s3356_s30 = scalar_select %p2817_p10, 1, 0 }
  0x2b   : > { %s1981_s15 = sshll.u32 %s429_s11, 3  ;;  %s2086_s7 = sshll.u32 %s2634_s26, 3 }
  0x2c   : > { %3357 = sst [smem:[#allocation27_spill]] %s3356_s30  ;;  %s431_s10 = scalar_lea.vmem [#allocation7], %s1981_s15 }
  0x2d   : > { %s3358_s1 = sld [smem:[#allocation32_spill]]  ;;  %s439_s17 = sshll.u32 %s431_s10, 4  ;;  %s440_s17 = int_to_ptr.vmem [resolvable:$true] %s439_s17 }
  0x2e   : > { %p2831_p12 = pnand %p3326_p9, %p88_p11  ;;  %s3360_s2 = sld [smem:[#allocation33_spill]] }
  0x2f   : > { %s2838_s30 = scalar_lea.sflag [#allocation8], %s427_s12  ;;  %s3361_s4 = smov 4  }
  0x30   : > { %s3362_s8 = smov 64   ;;  %s453_s10 = scalar_lea.vmem [#allocation9], %s1981_s15 }
  0x31   : > { %s3363_s5 = sld [smem:[#allocation36_spill]]  ;;  %s2644_s12 = smov [#allocation12]  }
  0x32   : > { %s3364_s9 = sld [smem:[#allocation40_spill]]  ;;  %s1971_s14 = sadd.s32 4294967294, %s2638_s27  }
  0x33   : > { %s436_s3 = scalar_lea.hbm %s3358_s1, %s2086_s7  ;;  %p60_p0 = scmp.ne.s32.totalorder %s2618_s22, %s2614_s21 }
  0x34   : > { %s437_s24 = sshll.u32 %s436_s3, 4  ;;  %s458_s11 = scalar_lea.hbm %s3360_s2, %s2086_s7  ;;  %s438_s24 = int_to_ptr.hbm [resolvable:$true] %s437_s24 }
  0x35   : > { %s459_s23 = sshll.u32 %s458_s11, 4  ;;  %s2848_s3 = sshll.u32 %s453_s10, 4  ;;  %s2846_s23 = int_to_ptr.hbm [resolvable:$true] %s459_s23  ;;  %s462_s3 = int_to_ptr.vmem [resolvable:$true] %s2848_s3 }
  0x36   : > { %2149 = dma.hbm_to_vmem [thread:$0]  (!%p2831_p12), %s438_s24, 128, %s440_s17, %s2838_s30, %s3362_s8, %s3362_s8, %s3361_s4  }
  0x37   : > { %s353_s7 = sshll.u32 %s3363_s5, 4  ;;  %s355_s11 = sshll.u32 %s2644_s12, 4  ;;  %s354_s7 = int_to_ptr.hbm [resolvable:$true] %s353_s7  ;;  %s356_s11 = int_to_ptr.vmem [resolvable:$true] %s355_s11 }
  0x38   : > { %s387_s15 = sshll.u32 %s3364_s9, 4  ;;  %s2645_s10 = smov [#allocation15]   ;;  %s388_s15 = int_to_ptr.hbm [resolvable:$true] %s387_s15 }
  0x39   : > { %2136 = dma.hbm_to_vmem [thread:$0]  (!%p2791_p5), %s354_s7, 256, %s356_s11, [#allocation11], %s3362_s8, %s3362_s8, %s3361_s4  }
  0x3a   : > { %s389_s6 = sshll.u32 %s2645_s10, 4  ;;  %s41_s12 = sadd.s32 1, %s2630_s25  ;;  %s390_s6 = int_to_ptr.vmem [resolvable:$true] %s389_s6 }
  0x3b   : > { %2142 = dma.hbm_to_vmem [thread:$0]  (!%p2791_p5), %s388_s15, 256, %s390_s6, [#allocation14], %s3362_s8, %s3362_s8, %s3361_s4  }
  0x3c   : > { %p42_p13 = scmp.ge.s32.totalorder %s41_s12, 2  ;;  %s44_s24 = sadd.s32 1, %s2634_s26 }
  0x3d   : > { %s53_s17 = sadd.s32 1, %s2618_s22  ;;  %p2879_p2 = por %p61_p6, %p60_p0 }
  0x3e   : > { %s3402_s12 = smov (%p42_p13, %s41_s12), 0  ;;  %s3404_s24 = smov (!%p42_p13, %s44_s24), %s2634_s26 }
  0x3f   : > { %3365 = sst [smem:[#allocation28_spill]] %s3402_s12  ;;  %s49_s16 = ssub.s32 %s2630_s25, %s3402_s12 }
  0x40   : > { %p46_p4 = scmp.ge.s32.totalorder %s3404_s24, 2  ;;  %p66_p5 = scmp.ne.s32.totalorder %s2614_s21, %s2610_s20 }
  0x41   : > { %p312_p7 = scmp.eq.s32.totalorder %s2775_s28, 3  ;;  %p318_p8 = scmp.eq.s32.totalorder %s1971_s14, 3 }
  0x42   : > { %s3406_s24 = smov (%p46_p4, %s3404_s24), 0  ;;  %p2890_p11 = por %p67_p1, %p66_p5 }
  0x43   : > { %3367 = sst [smem:[#allocation29_spill]] %s3406_s24  ;;  %p2894_p13 = por %p312_p7, %p60_p0 }
  0x44   : > { %s48_s10 = ssub.s32 %s2634_s26, %s3406_s24  ;;  %p2900_p6 = por %p318_p8, %p66_p5 }
  0x45   : > { %s3369_s15 = scalar_select %p2894_p13, 1, 0 }
  0x46   : > { %s3371_s6 = scalar_select %p2900_p6, 1, 0 }
  0x47   : > { %3370 = sst [smem:[#allocation30_spill]] %s3369_s15  ;;  %s50_s14 = sor.u32 %s49_s16, %s48_s10 }
  0x48   : > { %3372 = sst [smem:[#allocation31_spill]] %s3371_s6  ;;  %p77_p4 = scmp.eq.s32.totalorder %s48_s10, 0 }
  0x49   : > { %p51_p9 = scmp.eq.s32.totalorder %s50_s14, 0  ;;  %s406_s1 = sand.u32 1, %s2618_s22  }
  0x4a   : > { %s3373_s2 = sadd.s32 1, %s2606_s19  ;;  %s1978_s24 = sshll.u32 %s406_s1, 2 }
  0x4b   : > { %s2908_s5 = scalar_select %p77_p4, %s2606_s19, %s3373_s2  }
  0x4c   : > { %s2911_s9 = scalar_select %p51_p9, %s2618_s22, %s53_s17  }
  0x4d   : > { %s1979_s12 = sshll.u32 %s2634_s26, 1  ;;  %s410_s15 = scalar_lea.vmem [#allocation4], %s1978_s24 }
  0x4e   : > { %s414_s20 = sadd.s32 %s2630_s25, %s1979_s12  ;;  %s420_s18 = sshll.u32 %s410_s15, 4  ;;  %s421_s18 = int_to_ptr.vmem [resolvable:$true] %s420_s18 }
  0x4f   : > { %s1980_s28 = sshll.u32 %s414_s20, 2  ;;  %p3374_p0 = scmp.lt.s32.totalorder %s2638_s27, 4 }
  0x50   : > { %s416_s10 = scalar_lea.hbm %s3307_s0, %s1980_s28  ;;  %s407_s14 = scalar_lea.sflag [#allocation5], %s406_s1 }
  0x51   : > { %p2144_p5 = pnand %p3374_p0, %p2879_p2  ;;  %s418_s2 = sshll.u32 %s416_s10, 4  ;;  %s419_s2 = int_to_ptr.hbm [resolvable:$true] %s418_s2 }
  0x52   : > { %2152 = dma.hbm_to_vmem [thread:$0]  (!%p2831_p12), %s2846_s23, 128, %s462_s3, %s2838_s30, %s3362_s8, %s3362_s8, %s3361_s4  }
  0x53   : > { %2146 = dma.hbm_to_vmem [thread:$0]  (!%p2144_p5), %s419_s2, 64, %s421_s18, %s407_s14  }
  0x54   : > { %473 = sbr.rel (%p2783_p3) target bundleno = 1574 (0x626), region = 64  ;;  %s2933_s20 = sand.u32 (!%p2783_p3), 1, %s2614_s21  }
  0x55   : > { %s1988_s28 = sshll.u32 (!%p2783_p3), %s2933_s20, 2  ;;  %s476_s12 = scalar_lea.sflag (!%p2783_p3), [#allocation5], %s2933_s20 }
  0x56   : > { %s2937_s24 = scalar_lea.vmem (!%p2783_p3), [#allocation4], %s1988_s28 }
  0x59   : > { %2577 = dma.done.wait (%p2890_p11), %s476_s12, 64  }
  0x5a   : > { %2579 = vsyncadd (%p2890_p11), %s476_s12, 4294967232  ;;  %s3375_s1 = sld [smem:[#allocation26_spill]] }
  0x5b   : > { %s3376_s18 = sld [smem:[#allocation22_spill]] }
  0x60   : > { %s485_s13 = sand.u32 1, %s3375_s1  }
  0x61   : > { %s487_s29 = sand.u32 1, %s3376_s18   ;;  %s486_s4 = scalar_lea.sflag [#allocation8], %s485_s13 }
  0x62   : > { %s1989_s30 = sshll.u32 %s487_s29, 3 }
  0x63   : > { %s489_s8 = scalar_lea.vmem [#allocation7], %s1989_s30 }
  0x64   : > { %2581 = dma.done.wait (%p2817_p10), %s486_s4, 256  }
  0x65   : > { %2583 = vsyncadd (%p2817_p10), %s486_s4, 4294967040  ;;  %s499_s3 = scalar_lea.vmem [#allocation9], %s1989_s30 }
  0x66   : > { %2585 = dma.done.wait (%p67_p1), [#allocation11], 512  }
  0x67   : > { %2587 = vsyncadd (%p67_p1), [#allocation11], 4294966784 }
  0x68   : > { %2589 = dma.done.wait (%p67_p1), [#allocation14], 512  }
  0x69   : > { %2591 = vsyncadd (%p67_p1), [#allocation14], 4294966784  ;;  %s1995_s17 = sshll.u32 %s2933_s20, 3  ;;  %s3378_s11 = sld [smem:[#allocation24_spill]] }
  0x6a   : > { %s2958_s7 = scalar_lea.vmem [#allocation16], %s1995_s17 }
  0x6f   : > { %p1996_p3 = scmp.ne.s32.totalorder %s3378_s11, 0 }
  0x70   : > { %s3379_s16 = sld [smem:[#allocation37_spill]] (!%p1996_p3)  ;;  %s2646_s28 = smov (!%p1996_p3), 120  }
  0x71   : > { %573 = sbr.rel (%p1996_p3) target bundleno = 457 (0x1c9), region = 96  ;;  %s3380_s14 = sld [smem:[#allocation39_spill]] (!%p1996_p3) }
  0x72   : > { %s2647_s12 = smov (!%p1996_p3), 112   ;;  %s2648_s1 = smov (!%p1996_p3), 104  }
  0x76   : > { %v2090_v0 = vld [vmem:[#allocation12 + $0x8] sm:$0xff]  ;;  %vm599_vm0 = vcmask 261120   ;;  %v2093_v1 = vld [vmem:[#allocation13 + $0x8] sm:$0xff]  ;;  %v2089_v4 = vld [vmem:[#allocation12] sm:$0xff]  ;;  %v2649_v26 = vmov 1983009808  }
  0x77   : > { %v607_v2 = vsel %vm599_vm0, %v2090_v0, 0  ;;  %v655_v3 = vsel %vm599_vm0, %v2093_v1, 0  ;;  %v2092_v5 = vld [vmem:[#allocation13] sm:$0xff]  ;;  %v604_v6 = vsel %vm599_vm0, %v2089_v4, 0  ;;  %v2091_v9 = vld [vmem:[%s499_s3] sm:$0xff]  ;;  %v713_v27 = vunpack.c.l.s4 %v2649_v26 }
  0x78   : > { %615 = vmatpush.bf16.xpose.msra.mxu0 %v607_v2  ;;  %663 = vmatpush.bf16.xpose.msra.mxu1 %v655_v3  ;;  %v652_v7 = vsel %vm599_vm0, %v2092_v5, 0  ;;  %v2088_v8 = vld [vmem:[%s489_s8] sm:$0xff]  ;;  %v2274_v10 = vld [vmem:[%s3379_s16] ss:$0 sm:$0xff]  ;;  %v2650_v40 = vmov 1934713408  }
  0x79   : > { %v2275_v11 = vld [vmem:[%s3380_s14] ss:$0 sm:$0xff]  ;;  %v2979_v34 = vunpack.c.0.s8 %v713_v27  ;;  %v727_v41 = vunpack.c.l.s4 %v2650_v40  ;;  %vm722_vm1 = vcmask 1047556   ;;  %vm924_vm2 = vcmask 60416  }
  0x7b   : > { %v2989_v51 = vunpack.c.0.s8 %v727_v41 }
  0x80   : > { %616 = vmatpush.bf16.xpose.msra.mxu0 %v604_v6  ;;  %664 = vmatpush.bf16.xpose.msra.mxu1 %v652_v7 }
  0x87   : > { %2009 = vmatmul.msk.bf16.vlgmr.msra.gmra.mxu0 %vm599_vm0, %v2088_v8  ;;  %2022 = vmatmul.msk.bf16.vlgmr.msra.gmra.mxu1 %vm599_vm0, %v2091_v9 }
 0x104   : > { %v618_v12 = vpop.f32.mrf.mxu0  ;;  %v666_v13 = vpop.f32.mrf.mxu1 }
 0x105   : > { %v619_v14 = vadd.f32 %v2274_v10, %v618_v12  ;;  %v667_v15 = vadd.f32 %v2275_v11, %v666_v13 }
 0x107   : > { %v671_v16 = vpack.c.bf16 %v619_v14, %v619_v14  ;;  %v933_v17 = vpack.c.bf16 %v667_v15, %v667_v15 }
 0x109   : > { %937 = vrot.lane.b32.xlu1 %v933_v17, %s2646_s28  ;;  %679 = vrot.lane.b32.xlu2 %v671_v16, %s2647_s12  ;;  %v690_v33 = vshrl.u32 %v671_v16, 16  ;;  %v952_v36 = vshrl.u32 %v933_v17, 16 }
 0x10a   : > { %675 = vrot.lane.b32.xlu0 %v671_v16, %s2646_s28 }
 0x10c   : > { %v668_v18 = vpop.f32.mrf.mxu1  ;;  %v620_v21 = vpop.f32.mrf.mxu0 }
 0x10d   : > { %v669_v19 = vadd.f32 %v2275_v11, %v668_v18  ;;  %v621_v22 = vadd.f32 %v2274_v10, %v620_v21 }
 0x10f   : > { %v2967_v20 = vpack.c.bf16 %v669_v19, %v669_v19  ;;  %v2970_v23 = vpack.c.bf16 %v621_v22, %v621_v22 }
 0x111   : > { %939 = vrot.lane.b32.xlu1 %v2967_v20, %s2646_s28  ;;  %941 = vrot.lane.b32.xlu2 %v933_v17, %s2647_s12  ;;  %v964_v54 = vshrl.u32 %v2967_v20, 16  ;;  %v702_v60 = vshrl.u32 %v2970_v23, 16 }
 0x112   : > { %683 = vrot.lane.b32.xlu0 %v671_v16, %s2648_s1 }
 0x119   : > { %685 = vrot.lane.b32.xlu1 %v2970_v23, %s2648_s1  ;;  %681 = vrot.lane.b32.xlu2 %v2970_v23, %s2647_s12 }
 0x11a   : > { %677 = vrot.lane.b32.xlu0 %v2970_v23, %s2646_s28 }
 0x121   : > { %945 = vrot.lane.b32.xlu1 %v933_v17, %s2648_s1  ;;  %947 = vrot.lane.b32.xlu2 %v2967_v20, %s2648_s1 }
 0x122   : > { %943 = vrot.lane.b32.xlu0 %v2967_v20, %s2647_s12 }
 0x163   : > { %v680_v24 = vpop.permute.xlu2 %679 }
 0x164   : > { %v696_v46 = vshrl.u32 %v680_v24, 16 }
 0x16b   : > { %v2977_v25 = vpop.permute.xlu2 %941 }
 0x16c   : > { %v958_v57 = vshrl.u32 %v2977_v25, 16 }
 0x173   : > { %v682_v30 = vpop.permute.xlu2 %681 }
 0x174   : > { %v708_v58 = vshrl.u32 %v682_v30, 16 }
 0x17b   : > { %v938_v28 = vpop.permute.xlu1 %937  ;;  %v2991_v52 = vpop.permute.xlu2 %947 }
 0x17c   : > { %v676_v29 = vpop.permute.xlu0 %675  ;;  %v953_v32 = vshrl.u32 %v938_v28, 16  ;;  %v951_v38 = vpack.i.b16 %v938_v28, %v933_v17  ;;  %v971_v3 = vshrl.u32 %v2991_v52, 16 }
 0x17d   : > { %v691_v31 = vshrl.u32 %v676_v29, 16  ;;  %v689_v35 = vpack.i.b16 %v676_v29, %v671_v16 }
 0x17e   : > { %v954_v39 = vpack.i.b16 %v953_v32, %v952_v36  ;;  %v2984_v49 = vperm.slane %v951_v38, %v2979_v34 }
 0x17f   : > { %v692_v37 = vpack.i.b16 %v691_v31, %v690_v33  ;;  %v715_v42 = vperm.slane %v689_v35, %v2979_v34 }
 0x180   : > { %v2987_v50 = vperm.slane %v954_v39, %v2979_v34  ;;  %v985_v1 = vrot.slane %v2984_v49, 4 }
 0x181   : > { %v742_v44 = vperm.slane %v692_v37, %v2979_v34  ;;  %v724_v53 = vrot.slane %v715_v42, 4 }
 0x182   : > { %v1011_v2 = vrot.slane %v2987_v50, 4 }
 0x183   : > { %v940_v43 = vpop.permute.xlu1 %939  ;;  %v750_v59 = vrot.slane %v742_v44, 4 }
 0x184   : > { %v684_v45 = vpop.permute.xlu0 %683  ;;  %v965_v61 = vshrl.u32 %v940_v43, 16  ;;  %v963_v5 = vpack.i.b16 %v940_v43, %v2967_v20 }
 0x185   : > { %v695_v47 = vpack.i.b16 %v684_v45, %v680_v24  ;;  %v697_v48 = vshrl.u32 %v684_v45, 16 }
 0x186   : > { %v3008_v15 = vpack.i.b16 %v965_v61, %v964_v54  ;;  %v3021_v37 = vperm.slane %v963_v5, %v2979_v34 }
 0x187   : > { %v698_v55 = vpack.i.b16 %v697_v48, %v696_v46  ;;  %v720_v56 = vperm.slane %v695_v47, %v2979_v34 }
 0x189   : > { %v721_v62 = vrot.slane %v720_v56, 4  ;;  %v725_v63 = vsel %vm722_vm1, %v720_v56, %v724_v53  ;;  %v747_v0 = vperm.slane %v698_v55, %v2979_v34 }
 0x18a   : > { %v733_v4 = vperm.slane %v725_v63, %v2989_v51 }
 0x18b   : > { %v723_v6 = vsel %vm722_vm1, %v721_v62, %v715_v42  ;;  %v748_v7 = vrot.slane %v747_v0, 4  ;;  %v751_v8 = vsel %vm722_vm1, %v747_v0, %v750_v59  ;;  %v686_v9 = vpop.permute.xlu1 %685 }
 0x18c   : > { %v729_v10 = vperm.slane %v723_v6, %v2989_v51  ;;  %v736_v11 = vrot.slane %v733_v4, 4  ;;  %v759_v12 = vperm.slane %v751_v8, %v2989_v51  ;;  %v707_v13 = vpack.i.b16 %v686_v9, %v682_v30  ;;  %v678_v14 = vpop.permute.xlu0 %677 }
 0x18d   : > { %v749_v16 = vsel %vm722_vm1, %v748_v7, %v742_v44  ;;  %v709_v17 = vshrl.u32 %v686_v9, 16  ;;  %v701_v18 = vpack.i.b16 %v678_v14, %v2970_v23  ;;  %v703_v28 = vshrl.u32 %v678_v14, 16 }
 0x18e   : > { %v734_v19 = vrot.slane %v729_v10, 4  ;;  %v737_v20 = vsel %vm722_vm1, 0, %v736_v11  ;;  %v755_v21 = vperm.slane %v749_v16, %v2989_v51  ;;  %v762_v22 = vrot.slane %v759_v12, 4 }
 0x18f   : > { %v821_v24 = vrot.slane %v737_v20, 4  ;;  %v710_v26 = vpack.i.b16 %v709_v17, %v708_v58  ;;  %v773_v27 = vperm.slane %v707_v13, %v2979_v34  ;;  %v816_v32 = vsel %vm722_vm1, %v736_v11, %v729_v10 }
 0x190   : > { %v735_v29 = vsel %vm722_vm1, 0, %v734_v19  ;;  %v760_v30 = vrot.slane %v755_v21, 4  ;;  %v763_v31 = vsel %vm722_vm1, 0, %v762_v22  ;;  %v835_v33 = vsel %vm722_vm1, %v762_v22, %v755_v21 }
 0x191   : > { %v822_v23 = vsel %vm722_vm1, %v821_v24, %v735_v29  ;;  %v840_v35 = vrot.slane %v763_v31, 4  ;;  %v774_v36 = vrot.slane %v773_v27, 4  ;;  %v799_v40 = vperm.slane %v710_v26, %v2979_v34 }
 0x192   : > { %v761_v38 = vsel %vm722_vm1, 0, %v760_v30  ;;  %v826_v39 = vperm.slane %v822_v23, %v2979_v34  ;;  %v820_v41 = vperm.slane %v816_v32, %v2979_v34  ;;  %v704_v43 = vpack.i.b16 %v703_v28, %v702_v60 }
 0x193   : > { %v841_v42 = vsel %vm722_vm1, %v840_v35, %v761_v38  ;;  %v768_v44 = vperm.slane %v701_v18, %v2979_v34  ;;  %v946_v45 = vpop.permute.xlu1 %945  ;;  %v839_v47 = vperm.slane %v835_v33, %v2979_v34  ;;  %v800_v53 = vrot.slane %v799_v40, 4 }
 0x194   : > { %v827_v46 = vrot.slane %v826_v39, 4  ;;  %v845_v48 = vperm.slane %v841_v42, %v2979_v34  ;;  %v794_v56 = vperm.slane %v704_v43, %v2979_v34  ;;  %v957_v58 = vpack.i.b16 %v946_v45, %v2977_v25 }
 0x195   : > { %v775_v54 = vsel %vm722_vm1, %v774_v36, %v768_v44  ;;  %v776_v55 = vrot.slane %v768_v44, 4  ;;  %v959_v62 = vshrl.u32 %v946_v45, 16 }
 0x196   : > { %v828_v59 = vsel %vm722_vm1, %v827_v46, %v820_v41  ;;  %v846_v61 = vrot.slane %v845_v48, 4  ;;  %v781_v60 = vperm.slane %v775_v54, %v2989_v51  ;;  %v801_v4 = vsel %vm722_vm1, %v800_v53, %v794_v56  ;;  %v944_v46 = vpop.permute.xlu0 %943 }
 0x197   : > { %v832_v63 = vperm.slane %v828_v59, %v2989_v51  ;;  %v777_v0 = vsel %vm722_vm1, %v773_v27, %v776_v55  ;;  %v802_v5 = vrot.slane %v794_v56, 4  ;;  %v807_v9 = vperm.slane %v801_v4, %v2989_v51 }
 0x198   : > { %v847_v6 = vsel %vm722_vm1, %v846_v61, %v839_v47  ;;  %v785_v7 = vperm.slane %v777_v0, %v2989_v51  ;;  %v786_v8 = vrot.slane %v781_v60, 4  ;;  %v982_v13 = vperm.slane %v957_v58, %v2979_v34 }
 0x199   : > { %v833_v10 = vrot.slane %v832_v63, 4  ;;  %v851_v11 = vperm.slane %v847_v6, %v2989_v51  ;;  %v803_v12 = vsel %vm722_vm1, %v799_v40, %v802_v5  ;;  %v896_v14 = vshrl.u32 %v832_v63, 16 }
 0x19a   : > { %v788_v16 = vrot.slane %v785_v7, 4  ;;  %v811_v17 = vperm.slane %v803_v12, %v2989_v51  ;;  %v812_v18 = vrot.slane %v807_v9, 4  ;;  %v787_v26 = vsel %vm722_vm1, 0, %v786_v8 }
 0x19b   : > { %v834_v19 = vsel %vm722_vm1, 0, %v833_v10  ;;  %v852_v20 = vrot.slane %v851_v11, 4  ;;  %v894_v21 = vpack.i.b16 %v851_v11, %v832_v63  ;;  %v897_v22 = vshrl.u32 %v851_v11, 16 }
 0x19c   : > { %v904_v24 = vshrl.u32 %v834_v19, 16  ;;  %v789_v27 = vsel %vm722_vm1, 0, %v788_v16  ;;  %v814_v28 = vrot.slane %v811_v17, 4  ;;  %v854_v31 = vsel %vm722_vm1, %v788_v16, %v781_v60 }
 0x19d   : > { %v853_v29 = vsel %vm722_vm1, 0, %v852_v20  ;;  %v898_v30 = vpack.i.b16 %v897_v22, %v896_v14  ;;  %925 = vst.msk [vmem:[#allocation2] sm:$0xf] %vm924_vm2, %v894_v21  ;;  %v859_v32 = vrot.slane %v789_v27, 4  ;;  %v813_v35 = vsel %vm722_vm1, 0, %v812_v18 }
 0x19e   : > { %v902_v23 = vpack.i.b16 %v853_v29, %v834_v19  ;;  %v905_v33 = vshrl.u32 %v853_v29, 16  ;;  %v815_v36 = vsel %vm722_vm1, 0, %v814_v28  ;;  %v873_v39 = vsel %vm722_vm1, %v814_v28, %v807_v9 }
 0x19f   : > { %927 = vst.msk [vmem:[#allocation2 + $0x8] sm:$0xf] %vm924_vm2, %v898_v30  ;;  %v860_v38 = vsel %vm722_vm1, %v859_v32, %v787_v26  ;;  %v878_v40 = vrot.slane %v815_v36, 4  ;;  %v960_v41 = vpack.i.b16 %v959_v62, %v958_v57  ;;  %v858_v43 = vperm.slane %v854_v31, %v2979_v34 }
 0x1a0   : > { %v906_v42 = vpack.i.b16 %v905_v33, %v904_v24  ;;  %929 = vst.msk [vmem:[#allocation2 + $0x10] sm:$0xf] %vm924_vm2, %v902_v23  ;;  %v864_v44 = vperm.slane %v860_v38, %v2979_v34  ;;  %v983_v45 = vrot.slane %v982_v13, 4  ;;  %v877_v47 = vperm.slane %v873_v39, %v2979_v34 }
 0x1a1   : > { %v879_v48 = vsel %vm722_vm1, %v878_v40, %v813_v35  ;;  %v986_v53 = vsel %vm722_vm1, %v982_v13, %v985_v1  ;;  %v1008_v25 = vperm.slane %v960_v41, %v2979_v34  ;;  %v970_v1 = vshrl.u32 %v944_v46, 16 }
 0x1a2   : > { %931 = vst.msk [vmem:[#allocation2 + $0x18] sm:$0xf] %vm924_vm2, %v906_v42  ;;  %v865_v57 = vrot.slane %v864_v44, 4  ;;  %v883_v54 = vperm.slane %v879_v48, %v2979_v34  ;;  %v984_v55 = vsel %vm722_vm1, %v983_v45, %v2984_v49  ;;  %v994_v56 = vperm.slane %v986_v53, %v2989_v51 }
 0x1a3   : > { %v990_v58 = vperm.slane %v984_v55, %v2989_v51  ;;  %v1009_v59 = vrot.slane %v1008_v25, 4  ;;  %v1012_v61 = vsel %vm722_vm1, %v1008_v25, %v1011_v2  ;;  %v969_v6 = vpack.i.b16 %v2991_v52, %v944_v46 }
 0x1a4   : > { %v866_v60 = vsel %vm722_vm1, %v865_v57, %v858_v43  ;;  %v884_v62 = vrot.slane %v883_v54, 4  ;;  %v997_v63 = vrot.slane %v994_v56, 4  ;;  %v1020_v0 = vperm.slane %v1012_v61, %v2989_v51 }
 0x1a5   : > { %v870_v4 = vperm.slane %v866_v60, %v2989_v51  ;;  %v995_v5 = vrot.slane %v990_v58, 4  ;;  %v1010_v49 = vsel %vm722_vm1, %v1009_v59, %v2987_v50  ;;  %v972_v13 = vpack.i.b16 %v971_v3, %v970_v1 }
 0x1a6   : > { %v885_v7 = vsel %vm722_vm1, %v884_v62, %v877_v47  ;;  %v998_v8 = vsel %vm722_vm1, 0, %v997_v63  ;;  %v1016_v2 = vperm.slane %v1010_v49, %v2989_v51  ;;  %v1023_v9 = vrot.slane %v1020_v0, 4 }
 0x1a7   : > { %v871_v10 = vrot.slane %v870_v4, 4  ;;  %v889_v11 = vperm.slane %v885_v7, %v2989_v51  ;;  %v996_v12 = vsel %vm722_vm1, 0, %v995_v5  ;;  %v912_v14 = vshrl.u32 %v870_v4, 16 }
 0x1a8   : > { %v1021_v16 = vrot.slane %v1016_v2, 4  ;;  %v1024_v50 = vsel %vm722_vm1, 0, %v1023_v9  ;;  %v1082_v17 = vrot.slane %v998_v8, 4  ;;  %v1037_v22 = vrot.slane %v3021_v37, 4 }
 0x1a9   : > { %v872_v18 = vsel %vm722_vm1, 0, %v871_v10  ;;  %v890_v19 = vrot.slane %v889_v11, 4  ;;  %v910_v20 = vpack.i.b16 %v889_v11, %v870_v4  ;;  %v913_v21 = vshrl.u32 %v889_v11, 16 }
 0x1aa   : > { %v1055_v24 = vperm.slane %v3008_v15, %v2979_v34  ;;  %v1077_v26 = vsel %vm722_vm1, %v997_v63, %v990_v58  ;;  %v1083_v52 = vsel %vm722_vm1, %v1082_v17, %v996_v12  ;;  %v1022_v28 = vsel %vm722_vm1, 0, %v1021_v16 }
 0x1ab   : > { %v891_v3 = vsel %vm722_vm1, 0, %v890_v19  ;;  %v914_v27 = vpack.i.b16 %v913_v21, %v912_v14  ;;  %926 = vst.msk [vmem:[#allocation2 + $0x4] sm:$0xf] %vm924_vm2, %v910_v20  ;;  %v1087_v29 = vperm.slane %v1083_v52, %v2979_v34  ;;  %v920_v31 = vshrl.u32 %v872_v18, 16 }
 0x1ac   : > { %v918_v30 = vpack.i.b16 %v891_v3, %v872_v18  ;;  %v921_v32 = vshrl.u32 %v891_v3, 16  ;;  %v1101_v23 = vrot.slane %v1024_v50, 4  ;;  %v1081_v15 = vperm.slane %v1077_v26, %v2979_v34 }
 0x1ad   : > { %928 = vst.msk [vmem:[#allocation2 + $0xc] sm:$0xf] %vm924_vm2, %v914_v27  ;;  %v1088_v33 = vrot.slane %v1087_v29, 4  ;;  %v1034_v35 = vperm.slane %v969_v6, %v2979_v34  ;;  %v1060_v36 = vperm.slane %v972_v13, %v2979_v34  ;;  %v1063_v38 = vrot.slane %v1055_v24, 4 }
 0x1ae   : > { %v922_v39 = vpack.i.b16 %v921_v32, %v920_v31  ;;  %930 = vst.msk [vmem:[#allocation2 + $0x14] sm:$0xf] %vm924_vm2, %v918_v30  ;;  %v1096_v40 = vsel %vm722_vm1, %v1023_v9, %v1016_v2  ;;  %v1102_v41 = vsel %vm722_vm1, %v1101_v23, %v1022_v28 }
 0x1af   : > { %v1089_v42 = vsel %vm722_vm1, %v1088_v33, %v1081_v15  ;;  %v1106_v43 = vperm.slane %v1102_v41, %v2979_v34  ;;  %v1035_v44 = vrot.slane %v1034_v35, 4  ;;  %v1038_v45 = vsel %vm722_vm1, %v1034_v35, %v1037_v22 }
 0x1b0   : > { %932 = vst.msk [vmem:[#allocation2 + $0x1c] sm:$0xf] %vm924_vm2, %v922_v39  ;;  %v1093_v46 = vperm.slane %v1089_v42, %v2989_v51  ;;  %v1046_v47 = vperm.slane %v1038_v45, %v2989_v51  ;;  %v1061_v48 = vrot.slane %v1060_v36, 4  ;;  %v1064_v53 = vsel %vm722_vm1, %v1060_v36, %v1063_v38 }
 0x1b1   : > { %v1100_v25 = vperm.slane %v1096_v40, %v2979_v34  ;;  %v1107_v57 = vrot.slane %v1106_v43, 4  ;;  %v1036_v54 = vsel %vm722_vm1, %v1035_v44, %v3021_v37  ;;  %v1072_v55 = vperm.slane %v1064_v53, %v2989_v51 }
 0x1b2   : > { %v1094_v56 = vrot.slane %v1093_v46, 4  ;;  %v1042_v58 = vperm.slane %v1036_v54, %v2989_v51  ;;  %v1049_v59 = vrot.slane %v1046_v47, 4  ;;  %v1062_v1 = vsel %vm722_vm1, %v1061_v48, %v1055_v24 }
 0x1b3   : > { %v1108_v61 = vsel %vm722_vm1, %v1107_v57, %v1100_v25  ;;  %v1075_v60 = vrot.slane %v1072_v55, 4  ;;  %v1157_v5 = vshrl.u32 %v1093_v46, 16  ;;  %v1068_v37 = vperm.slane %v1062_v1, %v2989_v51 }
 0x1b4   : > { %v1095_v62 = vsel %vm722_vm1, 0, %v1094_v56  ;;  %v1112_v63 = vperm.slane %v1108_v61, %v2989_v51  ;;  %v1047_v0 = vrot.slane %v1042_v58, 4  ;;  %v1050_v4 = vsel %vm722_vm1, 0, %v1049_v59 }
 0x1b5   : > { %v1076_v49 = vsel %vm722_vm1, 0, %v1075_v60  ;;  %v1165_v9 = vshrl.u32 %v1095_v62, 16  ;;  %v1073_v10 = vrot.slane %v1068_v37, 4  ;;  %v1120_v11 = vrot.slane %v1050_v4, 4 }
 0x1b6   : > { %v1113_v6 = vrot.slane %v1112_v63, 4  ;;  %v1155_v7 = vpack.i.b16 %v1112_v63, %v1093_v46  ;;  %v1158_v8 = vshrl.u32 %v1112_v63, 16  ;;  %v1048_v2 = vsel %vm722_vm1, 0, %v1047_v0 }
 0x1b7   : > { %v1115_v14 = vsel %vm722_vm1, %v1049_v59, %v1042_v58  ;;  %v1139_v16 = vrot.slane %v1076_v49, 4  ;;  %v1074_v18 = vsel %vm722_vm1, 0, %v1073_v10  ;;  %v1121_v19 = vsel %vm722_vm1, %v1120_v11, %v1048_v2 }
 0x1b8   : > { %v1114_v12 = vsel %vm722_vm1, 0, %v1113_v6  ;;  %v1159_v13 = vpack.i.b16 %v1158_v8, %v1157_v5  ;;  %1185 = vst.msk [vmem:[#allocation3] sm:$0xf] %vm924_vm2, %v1155_v7  ;;  %v1125_v20 = vperm.slane %v1121_v19, %v2979_v34  ;;  %v1134_v21 = vsel %vm722_vm1, %v1075_v60, %v1068_v37 }
 0x1b9   : > { %v1163_v50 = vpack.i.b16 %v1114_v12, %v1095_v62  ;;  %v1166_v17 = vshrl.u32 %v1114_v12, 16  ;;  %v1140_v22 = vsel %vm722_vm1, %v1139_v16, %v1074_v18  ;;  %v1119_v52 = vperm.slane %v1115_v14, %v2979_v34 }
 0x1ba   : > { %1187 = vst.msk [vmem:[#allocation3 + $0x8] sm:$0xf] %vm924_vm2, %v1159_v13  ;;  %v1144_v26 = vperm.slane %v1140_v22, %v2979_v34  ;;  %v1126_v3 = vrot.slane %v1125_v20, 4  ;;  %v1138_v27 = vperm.slane %v1134_v21, %v2979_v34 }
 0x1bb   : > { %v1167_v24 = vpack.i.b16 %v1166_v17, %v1165_v9  ;;  %1189 = vst.msk [vmem:[#allocation3 + $0x10] sm:$0xf] %vm924_vm2, %v1163_v50 }
 0x1bc   : > { %v1145_v28 = vrot.slane %v1144_v26, 4  ;;  %v1127_v29 = vsel %vm722_vm1, %v1126_v3, %v1119_v52 }
 0x1bd   : > { %1191 = vst.msk [vmem:[#allocation3 + $0x18] sm:$0xf] %vm924_vm2, %v1167_v24  ;;  %v1131_v30 = vperm.slane %v1127_v29, %v2989_v51 }
 0x1be   : > { %v1146_v31 = vsel %vm722_vm1, %v1145_v28, %v1138_v27 }
 0x1bf   : > { %v1150_v32 = vperm.slane %v1146_v31, %v2989_v51  ;;  %v1132_v23 = vrot.slane %v1131_v30, 4  ;;  %v1173_v35 = vshrl.u32 %v1131_v30, 16 }
 0x1c1   : > { %v1151_v15 = vrot.slane %v1150_v32, 4  ;;  %v1171_v33 = vpack.i.b16 %v1150_v32, %v1131_v30  ;;  %v1174_v36 = vshrl.u32 %v1150_v32, 16  ;;  %v1133_v38 = vsel %vm722_vm1, 0, %v1132_v23 }
 0x1c2   : > { %v1181_v41 = vshrl.u32 %v1133_v38, 16 }
 0x1c3   : > { %v1152_v39 = vsel %vm722_vm1, 0, %v1151_v15  ;;  %v1175_v40 = vpack.i.b16 %v1174_v36, %v1173_v35  ;;  %1186 = vst.msk [vmem:[#allocation3 + $0x4] sm:$0xf] %vm924_vm2, %v1171_v33 }
 0x1c4   : > { %v1179_v34 = vpack.i.b16 %v1152_v39, %v1133_v38  ;;  %v1182_v42 = vshrl.u32 %v1152_v39, 16 }
 0x1c5   : > { %1188 = vst.msk [vmem:[#allocation3 + $0xc] sm:$0xf] %vm924_vm2, %v1175_v40 }
 0x1c6   : > { %v1183_v43 = vpack.i.b16 %v1182_v42, %v1181_v41  ;;  %1190 = vst.msk [vmem:[#allocation3 + $0x14] sm:$0xf] %vm924_vm2, %v1179_v34 }
 0x1c8   : > { %1192 = vst.msk [vmem:[#allocation3 + $0x1c] sm:$0xf] %vm924_vm2, %v1183_v43 }
 0x1c9 PF: > { %v2095_v51 = vld [vmem:[#allocation10 + $0x8] sm:$0xff]  ;;  %vm1212_vm3 = vcmask 261120   ;;  %v2094_v45 = vld [vmem:[#allocation10] sm:$0xff]  ;;  %v1193_v47 = vld [vmem:[%s2937_s24] sm:$0xf]  ;;  %s3381_s13 = sld [smem:[#allocation35_spill]] }
 0x1ca   : > { %v1220_v44 = vsel %vm1212_vm3, %v2095_v51, 0  ;;  %v1217_v46 = vsel %vm1212_vm3, %v2094_v45, 0  ;;  %s2651_s29 = smov 104   ;;  %s2652_s30 = smov 120   ;;  %v2096_v55 = vld [vmem:[#allocation2] sm:$0xff]  ;;  %vm1371_vm4 = vcmask 64512  }
 0x1cb   : > { %1228 = vmatpush.bf16.xpose.msra.mxu0 %v1220_v44  ;;  %s2653_s4 = smov 112   ;;  %v2097_v56 = vld [vmem:[#allocation2 + $0x8] sm:$0xff]  ;;  %v2098_v58 = vld [vmem:[#allocation2 + $0x10] sm:$0xff]  ;;  %v1376_v59 = vsel %vm1371_vm4, %v2096_v55, 0  ;;  %v2654_v60 = vmov 1983009808  }
 0x1cc   : > { %v1400_v61 = vsel %vm1371_vm4, %v2097_v56, 0  ;;  %v1424_v1 = vsel %vm1371_vm4, %v2098_v58, 0  ;;  %1385 = vmatpush.bf16.xpose.msra.mxu1 %v1376_v59  ;;  %v1257_v62 = vunpack.c.l.s4 %v2654_v60  ;;  %v2099_v49 = vld [vmem:[#allocation2 + $0x18] sm:$0xff]  ;;  %v2655_v8 = vmov 1934713408   ;;  %s2656_s24 = smov 8  }
 0x1cd   : > { %1409 = vmatpush.bf16.xpose.msra.mxu2 %v1400_v61  ;;  %1433 = vmatpush.bf16.xpose.msra.mxu3 %v1424_v1  ;;  %v1271_v2 = vunpack.c.l.s4 %v2655_v8  ;;  %v1448_v9 = vsel %vm1371_vm4, %v2099_v49, 0  ;;  %vm1266_vm5 = vcmask 1047556   ;;  %vm1463_vm6 = vcmask 130048   ;;  %s2657_s8 = smov 16   ;;  %s2658_s3 = smov 24  }
 0x1ce   : > { %v3162_v4 = vunpack.c.0.s8 %v1257_v62  ;;  %s3382_s17 = sld [smem:[#allocation25_spill]]  ;;  %vm1743_vm7 = vcmask 195584  }
 0x1cf   : > { %v2276_v48 = vld [vmem:[%s3381_s13] ss:$0 sm:$0xff]  ;;  %v3167_v50 = vunpack.c.0.s8 %v1271_v2  ;;  %s3383_s11 = sld [smem:[#allocation24_spill]]  ;;  %s1801_s13 = sshll.u32 %s2958_s7, 4  ;;  %s1802_s13 = int_to_ptr.vmem [resolvable:$true] %s1801_s13 }
 0x1d0   : > { %s3385_s28 = sld [smem:[#allocation42_spill]] }
 0x1d1   : > { %s3386_s23 = sld [smem:[#allocation41_spill]] }
 0x1d3   : > { %1229 = vmatpush.bf16.xpose.msra.mxu0 %v1217_v46 }
 0x1d4   : > { %1457 = vmatpush.bf16.xpose.msrb.mxu1 %v1448_v9  ;;  %s2082_s15 = sshll.u32 %s3382_s17, 1 }
 0x1d5   : > { %s1797_s6 = sadd.s32 %s3383_s11, %s2082_s15 }
 0x1d6   : > { %s2083_s10 = sshll.u32 %s1797_s6, 3  ;;  %s2524_s17 = scalar_lea.hbm %s3385_s28, 32 }
 0x1d7   : > { %s1799_s12 = scalar_lea.hbm %s3385_s28, %s2083_s10 }
 0x1da   : > { %2031 = vmatmul.msk.bf16.vlgmr.msra.gmra.mxu0 %vm1212_vm3, %v1193_v47 }
 0x257   : > { %v1231_v53 = vpop.f32.mrf.mxu0 }
 0x258   : > { %v1232_v25 = vadd.f32 %v2276_v48, %v1231_v53 }
 0x25a   : > { %v1235_v57 = vpack.c.bf16 %v1232_v25, %v1232_v25 }
 0x25c   : > { %1241 = vrot.lane.b32.xlu1 %v1235_v57, %s2651_s29  ;;  %1237 = vrot.lane.b32.xlu0 %v1235_v57, %s2652_s30  ;;  %v1246_v37 = vshrl.u32 %v1235_v57, 16  ;;  %s1803_s29 = sshll.u32 %s1799_s12, 4  ;;  %s1787_s30 = scalar_lea.sflag [#allocation6], %s2933_s20  ;;  %s1804_s29 = int_to_ptr.hbm [resolvable:$true] %s1803_s29 }
 0x25f   : > { %v1233_v54 = vpop.f32.mrf.mxu0 }
 0x264   : > { %1239 = vrot.lane.b32.xlu0 %v1235_v57, %s2653_s4  ;;  %s2518_s4 = sshra.s32 %s1804_s29, 4  ;;  %s2519_s4 = int_to_ptr.hbm [resolvable:$true] %s2518_s4 }
 0x265   : > { %p2525_p12 = scmp.lt.s32.totalorder %s2519_s4, %s3385_s28 }
 0x2ce   : > { %v1238_v63 = vpop.permute.xlu0 %1237  ;;  %v1242_v7 = vpop.permute.xlu1 %1241 }
 0x2cf   : > { %v1247_v0 = vshrl.u32 %v1238_v63, 16  ;;  %v1245_v5 = vpack.i.b16 %v1238_v63, %v1235_v57  ;;  %v1253_v12 = vshrl.u32 %v1242_v7, 16 }
 0x2d1   : > { %v1248_v6 = vpack.i.b16 %v1247_v0, %v1246_v37  ;;  %v1259_v10 = vperm.slane %v1245_v5, %v3162_v4 }
 0x2d3   : > { %v1286_v13 = vperm.slane %v1248_v6, %v3162_v4  ;;  %v1268_v17 = vrot.slane %v1259_v10, 4 }
 0x2d5   : > { %v1294_v20 = vrot.slane %v1286_v13, 4 }
 0x2d6   : > { %v1240_v11 = vpop.permute.xlu0 %1239 }
 0x2d7   : > { %v1251_v14 = vpack.i.b16 %v1242_v7, %v1240_v11  ;;  %v1252_v16 = vshrl.u32 %v1240_v11, 16 }
 0x2d9   : > { %v1254_v18 = vpack.i.b16 %v1253_v12, %v1252_v16  ;;  %v1264_v19 = vperm.slane %v1251_v14, %v3162_v4 }
 0x2db   : > { %v1265_v21 = vrot.slane %v1264_v19, 4  ;;  %v1269_v22 = vsel %vm1266_vm5, %v1264_v19, %v1268_v17  ;;  %v1291_v24 = vperm.slane %v1254_v18, %v3162_v4 }
 0x2dc   : > { %v1277_v26 = vperm.slane %v1269_v22, %v3167_v50 }
 0x2dd   : > { %v1267_v52 = vsel %vm1266_vm5, %v1265_v21, %v1259_v10  ;;  %v1292_v3 = vrot.slane %v1291_v24, 4  ;;  %v1295_v27 = vsel %vm1266_vm5, %v1291_v24, %v1294_v20 }
 0x2de   : > { %v1273_v28 = vperm.slane %v1267_v52, %v3167_v50  ;;  %v1280_v29 = vrot.slane %v1277_v26, 4  ;;  %v1303_v30 = vperm.slane %v1295_v27, %v3167_v50 }
 0x2df   : > { %v1293_v31 = vsel %vm1266_vm5, %v1292_v3, %v1286_v13 }
 0x2e0   : > { %v1278_v32 = vrot.slane %v1273_v28, 4  ;;  %v1281_v23 = vsel %vm1266_vm5, 0, %v1280_v29  ;;  %v1299_v15 = vperm.slane %v1293_v31, %v3167_v50  ;;  %v1306_v33 = vrot.slane %v1303_v30, 4 }
 0x2e1   : > { %v1313_v35 = vrot.slane %v1281_v23, 4  ;;  %v1308_v40 = vsel %vm1266_vm5, %v1280_v29, %v1273_v28 }
 0x2e2   : > { %v1279_v36 = vsel %vm1266_vm5, 0, %v1278_v32  ;;  %v1304_v38 = vrot.slane %v1299_v15, 4  ;;  %v1307_v39 = vsel %vm1266_vm5, 0, %v1306_v33  ;;  %v1327_v51 = vsel %vm1266_vm5, %v1306_v33, %v1299_v15 }
 0x2e3   : > { %v1332_v34 = vrot.slane %v1307_v39, 4  ;;  %v1314_v41 = vsel %vm1266_vm5, %v1313_v35, %v1279_v36  ;;  %v1312_v45 = vperm.slane %v1308_v40, %v3162_v4  ;;  %v1331_v53 = vperm.slane %v1327_v51, %v3162_v4  ;;  %v2101_v39 = vld [vmem:[#allocation3 + $0x8] sm:$0xff]  ;;  %v2102_v40 = vld [vmem:[#allocation3 + $0x10] sm:$0xff] }
 0x2e4   : > { %v1305_v42 = vsel %vm1266_vm5, 0, %v1304_v38  ;;  %v1318_v43 = vperm.slane %v1314_v41, %v3162_v4  ;;  %v2100_v38 = vld [vmem:[#allocation3] sm:$0xff]  ;;  %1558 = vmatpush.bf16.msrb.mxu3 %v2101_v39  ;;  %1580 = vmatpush.bf16.msrb.mxu0 %v2102_v40 }
 0x2e5   : > { %v1333_v44 = vsel %vm1266_vm5, %v1332_v34, %v1305_v42  ;;  %1536 = vmatpush.bf16.msrb.mxu2 %v2100_v38  ;;  %v2103_v34 = vld [vmem:[#allocation3 + $0x18] sm:$0xff] }
 0x2e6   : > { %v1319_v46 = vrot.slane %v1318_v43, 4  ;;  %v1337_v47 = vperm.slane %v1333_v44, %v3162_v4 }
 0x2e8   : > { %v1320_v48 = vsel %vm1266_vm5, %v1319_v46, %v1312_v45  ;;  %v1338_v25 = vrot.slane %v1337_v47, 4 }
 0x2e9   : > { %v1324_v57 = vperm.slane %v1320_v48, %v3167_v50 }
 0x2ea   : > { %v1339_v54 = vsel %vm1266_vm5, %v1338_v25, %v1331_v53 }
 0x2eb   : > { %v1343_v55 = vperm.slane %v1339_v54, %v3167_v50  ;;  %v1325_v56 = vrot.slane %v1324_v57, 4  ;;  %v1349_v59 = vshrl.u32 %v1324_v57, 16 }
 0x2ed   : > { %v1348_v58 = vpack.i.b16 %v1343_v55, %v1324_v57  ;;  %v1350_v61 = vshrl.u32 %v1343_v55, 16  ;;  %v1344_v1 = vrot.slane %v1343_v55, 4  ;;  %v1326_v62 = vsel %vm1266_vm5, 0, %v1325_v56 }
 0x2ee   : > { %v1355_v37 = vshrl.u32 %v1326_v62, 16 }
 0x2ef   : > { %2036 = vmatmul.msk.bf16.vlgmr.msra.gmra.mxu1 %vm1371_vm4, %v1348_v58  ;;  %v1351_v60 = vpack.i.b16 %v1350_v61, %v1349_v59  ;;  %v1345_v63 = vsel %vm1266_vm5, 0, %v1344_v1 }
 0x2f0   : > { %v1354_v0 = vpack.i.b16 %v1345_v63, %v1326_v62  ;;  %v1356_v5 = vshrl.u32 %v1345_v63, 16  ;;  %1602 = vmatpush.bf16.msra.mxu1 %v2103_v34 }
 0x2f1   : > { %2041 = vmatmul.msk.bf16.vlgmr.msra.gmra.mxu2 %vm1371_vm4, %v1351_v60 }
 0x2f2   : > { %2046 = vmatmul.msk.bf16.vlgmr.msra.gmra.mxu3 %vm1371_vm4, %v1354_v0  ;;  %v1357_v49 = vpack.i.b16 %v1356_v5, %v1355_v37 }
 0x2ff   : > { %2051 = vmatmul.msk.bf16.vlgmr.msrb.gmra.mxu1 %vm1371_vm4, %v1357_v49 }
 0x36c   : > { %v1387_v6 = vpop.f32.mrf.mxu1 }
 0x36d   : > { %v1464_v7 = vsel %vm1463_vm6, %v1387_v6, -inf }
 0x36e   : > { %1465 = vmax.xlane.f32.xlu1 %v1464_v7 }
 0x374   : > { %v1389_v8 = vpop.f32.mrf.mxu1  ;;  %v1411_v2 = vpop.f32.mrf.mxu2 }
 0x375   : > { %v1435_v9 = vpop.f32.mrf.mxu3  ;;  %v1467_v10 = vsel %vm1463_vm6, %v1411_v2, -inf }
 0x376   : > { %1468 = vmax.xlane.f32.xlu2 %v1467_v10  ;;  %v1470_v16 = vsel %vm1463_vm6, %v1435_v9, -inf }
 0x37c   : > { %v1413_v11 = vpop.f32.mrf.mxu2  ;;  %v1459_v12 = vpop.f32.mrf.mxu1 }
 0x37d   : > { %v1437_v13 = vpop.f32.mrf.mxu3  ;;  %v1473_v14 = vsel %vm1463_vm6, %v1459_v12, -inf }
 0x37e   : > { %1474 = vmax.xlane.f32.xlu0 %v1473_v14  ;;  %1471 = vmax.xlane.f32.xlu2 %v1470_v16 }
 0x384   : > { %v1461_v17 = vpop.f32.mrf.mxu1 }
 0x3e1   : > { %v1466_v18 = vpop.xlane.xlu1 %1465 }
 0x3e2   : > { %v1476_v19 = vsub.f32 %v1387_v6, %v1466_v18 }
 0x3e4   : > { %v1480_v20 = vmul.f32 1.442695, %v1476_v19 }
 0x3e6   : > { %2278 = vpow2.f32 %v1480_v20 }
 0x3e9   : > { %v1469_v21 = vpop.xlane.xlu2 %1468 }
 0x3ea   : > { %v1477_v22 = vsub.f32 %v1411_v2, %v1469_v21 }
 0x3ec   : > { %v2279_v24 = vpop.eup %2278  ;;  %v1482_v26 = vmul.f32 1.442695, %v1477_v22 }
 0x3ed   : > { %v1488_v52 = vsel %vm1463_vm6, %v2279_v24, 0.0 }
 0x3ee   : > { %2280 = vpow2.f32 %v1482_v26  ;;  %1489 = vadd.xlane.f32.xlu2 %v1488_v52 }
 0x3f1   : > { %v1472_v3 = vpop.xlane.xlu2 %1471  ;;  %v1475_v27 = vpop.xlane.xlu0 %1474 }
 0x3f2   : > { %v1478_v28 = vsub.f32 %v1435_v9, %v1472_v3  ;;  %v1479_v31 = vsub.f32 %v1459_v12, %v1475_v27 }
 0x3f4   : > { %v2281_v29 = vpop.eup %2280  ;;  %v1484_v30 = vmul.f32 1.442695, %v1478_v28  ;;  %v1486_v23 = vmul.f32 1.442695, %v1479_v31 }
 0x3f5   : > { %v1491_v32 = vsel %vm1463_vm6, %v2281_v29, 0.0 }
 0x3f6   : > { %1492 = vadd.xlane.f32.xlu2 %v1491_v32  ;;  %2282 = vpow2.f32 %v1484_v30 }
 0x3f7   : > { %2284 = vpow2.f32 %v1486_v23 }
 0x3fc   : > { %v2283_v15 = vpop.eup %2282 }
 0x3fd   : > { %v1494_v33 = vsel %vm1463_vm6, %v2283_v15, 0.0  ;;  %v2285_v35 = vpop.eup %2284 }
 0x3fe   : > { %1495 = vadd.xlane.f32.xlu2 %v1494_v33  ;;  %v1497_v36 = vsel %vm1463_vm6, %v2285_v35, 0.0 }
 0x406   : > { %1498 = vadd.xlane.f32.xlu2 %v1497_v36 }
 0x461   : > { %v1490_v41 = vpop.xlane.xlu2 %1489 }
 0x462   : > { %2286 = vrcp.f32 %v1490_v41 }
 0x468   : > { %v2287_v42 = vpop.eup %2286 }
 0x469   : > { %v1504_v43 = vmul.f32 %v2287_v42, %v2279_v24  ;;  %v1493_v51 = vpop.xlane.xlu2 %1492 }
 0x46a   : > { %2288 = vrcp.f32 %v1493_v51 }
 0x46b   : > { %v1508_v44 = vpack.c.bf16 %v1504_v43, %v1504_v43 }
 0x46d   : > { %2056 = vmatmul.msk.bf16.vlgmr.msrb.gmra.mxu2 %vm1463_vm6, %v1508_v44 }
 0x470   : > { %v2289_v45 = vpop.eup %2288 }
 0x471   : > { %v1505_v46 = vmul.f32 %v2289_v45, %v2281_v29  ;;  %v1496_v47 = vpop.xlane.xlu2 %1495 }
 0x472   : > { %2290 = vrcp.f32 %v1496_v47 }
 0x473   : > { %v1509_v48 = vpack.c.bf16 %v1505_v46, %v1505_v46 }
 0x475   : > { %2061 = vmatmul.msk.bf16.vlgmr.msrb.gmra.mxu3 %vm1463_vm6, %v1509_v48 }
 0x478   : > { %v2291_v53 = vpop.eup %2290 }
 0x479   : > { %v1506_v25 = vmul.f32 %v2291_v53, %v2283_v15  ;;  %v1499_v57 = vpop.xlane.xlu2 %1498 }
 0x47a   : > { %2292 = vrcp.f32 %v1499_v57 }
 0x47b   : > { %v1510_v54 = vpack.c.bf16 %v1506_v25, %v1506_v25 }
 0x47d   : > { %2066 = vmatmul.msk.bf16.vlgmr.msrb.gmra.mxu0 %vm1463_vm6, %v1510_v54 }
 0x480   : > { %v2293_v55 = vpop.eup %2292 }
 0x481   : > { %v1507_v56 = vmul.f32 %v2293_v55, %v2285_v35 }
 0x483   : > { %v1511_v58 = vpack.c.bf16 %v1507_v56, %v1507_v56 }
 0x485   : > { %2071 = vmatmul.msk.bf16.vlgmr.msra.gmra.mxu1 %vm1463_vm6, %v1511_v58 }
 0x4f0   : > { %v1538_v59 = vpop.f32.mrf.mxu2 }
 0x4f1   : > { %v1608_v63 = vpack.c.bf16 %v1538_v59, %v1538_v59 }
 0x4f3   : > { %v1615_v5 = vshrl.u32 %v1608_v63, 16 }
 0x4f8   : > { %v1540_v61 = vpop.f32.mrf.mxu2  ;;  %v1560_v1 = vpop.f32.mrf.mxu3 }
 0x4f9   : > { %v1609_v60 = vpack.c.bf16 %v1560_v1, %v1560_v1 }
 0x4fa   : > { %v1582_v62 = vpop.f32.mrf.mxu0 }
 0x4fb   : > { %v1616_v0 = vshrl.u32 %v1609_v60, 16  ;;  %v1614_v37 = vpack.i.b16 %v1609_v60, %v1608_v63  ;;  %v1610_v7 = vpack.c.bf16 %v1582_v62, %v1582_v62 }
 0x4fd   : > { %v1617_v6 = vpack.i.b16 %v1616_v0, %v1615_v5  ;;  %v1628_v9 = vperm.slane %v1614_v37, %v3162_v4  ;;  %v1621_v12 = vshrl.u32 %v1610_v7, 16 }
 0x4ff   : > { %v1654_v11 = vperm.slane %v1617_v6, %v3162_v4  ;;  %v1636_v16 = vrot.slane %v1628_v9, 4 }
 0x500   : > { %v1562_v49 = vpop.f32.mrf.mxu3 }
 0x501   : > { %v1662_v19 = vrot.slane %v1654_v11, 4 }
 0x502   : > { %v1584_v8 = vpop.f32.mrf.mxu0  ;;  %v1604_v2 = vpop.f32.mrf.mxu1 }
 0x503   : > { %v1611_v10 = vpack.c.bf16 %v1604_v2, %v1604_v2 }
 0x505   : > { %v1620_v13 = vpack.i.b16 %v1611_v10, %v1610_v7  ;;  %v1622_v14 = vshrl.u32 %v1611_v10, 16 }
 0x507   : > { %v1623_v17 = vpack.i.b16 %v1622_v14, %v1621_v12  ;;  %v1633_v18 = vperm.slane %v1620_v13, %v3162_v4 }
 0x509   : > { %v1634_v20 = vrot.slane %v1633_v18, 4  ;;  %v1637_v21 = vsel %vm1266_vm5, %v1633_v18, %v1636_v16  ;;  %v1659_v22 = vperm.slane %v1623_v17, %v3162_v4 }
 0x50a   : > { %v1645_v24 = vperm.slane %v1637_v21, %v3167_v50  ;;  %v1606_v26 = vpop.f32.mrf.mxu1 }
 0x50b   : > { %v1635_v52 = vsel %vm1266_vm5, %v1634_v20, %v1628_v9  ;;  %v1660_v3 = vrot.slane %v1659_v22, 4  ;;  %v1663_v27 = vsel %vm1266_vm5, %v1659_v22, %v1662_v19  ;;  %v2105_v9 = vld [vmem:[#allocation15 + $0x8] sm:$0xff] }
 0x50c   : > { %v1641_v28 = vperm.slane %v1635_v52, %v3167_v50  ;;  %v1648_v29 = vrot.slane %v1645_v24, 4  ;;  %v1671_v30 = vperm.slane %v1663_v27, %v3167_v50  ;;  %v1770_v10 = vsel %vm1212_vm3, %v2105_v9, 0  ;;  %v2277_v20 = vld [vmem:[%s3386_s23] ss:$0 sm:$0xff] }
 0x50d   : > { %v1661_v31 = vsel %vm1266_vm5, %v1660_v3, %v1654_v11  ;;  %1778 = vmatpush.bf16.xpose.msra.mxu2 %v1770_v10  ;;  %v2104_v11 = vld [vmem:[#allocation15] sm:$0xff] }
 0x50e   : > { %v1646_v32 = vrot.slane %v1641_v28, 4  ;;  %v1649_v23 = vsel %vm1266_vm5, 0, %v1648_v29  ;;  %v1667_v15 = vperm.slane %v1661_v31, %v3167_v50  ;;  %v1674_v33 = vrot.slane %v1671_v30, 4 }
 0x50f   : > { %v1681_v35 = vrot.slane %v1649_v23, 4  ;;  %v1676_v40 = vsel %vm1266_vm5, %v1648_v29, %v1641_v28  ;;  %v1767_v12 = vsel %vm1212_vm3, %v2104_v11, 0 }
 0x510   : > { %v1647_v36 = vsel %vm1266_vm5, 0, %v1646_v32  ;;  %v1672_v38 = vrot.slane %v1667_v15, 4  ;;  %v1675_v39 = vsel %vm1266_vm5, 0, %v1674_v33  ;;  %v1695_v51 = vsel %vm1266_vm5, %v1674_v33, %v1667_v15 }
 0x511   : > { %v1682_v34 = vsel %vm1266_vm5, %v1681_v35, %v1647_v36  ;;  %v1700_v41 = vrot.slane %v1675_v39, 4  ;;  %v1680_v45 = vperm.slane %v1676_v40, %v3162_v4  ;;  %v1699_v53 = vperm.slane %v1695_v51, %v3162_v4 }
 0x512   : > { %v1673_v42 = vsel %vm1266_vm5, 0, %v1672_v38  ;;  %v1686_v43 = vperm.slane %v1682_v34, %v3162_v4 }
 0x513   : > { %v1701_v44 = vsel %vm1266_vm5, %v1700_v41, %v1673_v42 }
 0x514   : > { %v1687_v46 = vrot.slane %v1686_v43, 4  ;;  %v1705_v47 = vperm.slane %v1701_v44, %v3162_v4 }
 0x515   : > { %1779 = vmatpush.bf16.xpose.msra.mxu2 %v1767_v12 }
 0x516   : > { %v1688_v48 = vsel %vm1266_vm5, %v1687_v46, %v1680_v45  ;;  %v1706_v25 = vrot.slane %v1705_v47, 4 }
 0x517   : > { %v1692_v57 = vperm.slane %v1688_v48, %v3167_v50 }
 0x518   : > { %v1707_v54 = vsel %vm1266_vm5, %v1706_v25, %v1699_v53 }
 0x519   : > { %v1711_v55 = vperm.slane %v1707_v54, %v3167_v50  ;;  %v1693_v56 = vrot.slane %v1692_v57, 4  ;;  %v1717_v58 = vshrl.u32 %v1692_v57, 16 }
 0x51b   : > { %v1718_v59 = vshrl.u32 %v1711_v55, 16  ;;  %v1694_v61 = vsel %vm1266_vm5, 0, %v1693_v56  ;;  %v1712_v1 = vrot.slane %v1711_v55, 4  ;;  %v1716_v60 = vpack.i.b16 %v1711_v55, %v1692_v57 }
 0x51c   : > { %v1723_v5 = vshrl.u32 %v1694_v61, 16 }
 0x51d   : > { %v1719_v62 = vpack.i.b16 %v1718_v59, %v1717_v58  ;;  %v1713_v63 = vsel %vm1266_vm5, 0, %v1712_v1 }
 0x51e   : > { %v1722_v0 = vpack.i.b16 %v1713_v63, %v1694_v61  ;;  %v1724_v4 = vshrl.u32 %v1713_v63, 16 }
 0x51f   : > { %v1726_v37 = vunpack.c.l.b16 %v1719_v62 }
 0x520   : > { %v1730_v49 = vunpack.c.l.b16 %v1722_v0  ;;  %v1725_v6 = vpack.i.b16 %v1724_v4, %v1723_v5 }
 0x521   : > { %v1727_v7 = vpack.c.b16 %v1726_v37, %v1726_v37 }
 0x522   : > { %v1731_v8 = vpack.c.b16 %v1730_v49, %v1730_v49  ;;  %v1734_v2 = vunpack.c.l.b16 %v1725_v6 }
 0x523   : > { %1728 = vrot.lane.b32.xlu2 %v1727_v7, %s2656_s24  ;;  %s2520_s24 = scalar_lea.hbm %s2519_s4, 8 }
 0x524   : > { %1732 = vrot.lane.b32.xlu1 %v1731_v8, %s2657_s8  ;;  %v1735_v50 = vpack.c.b16 %v1734_v2, %v1734_v2  ;;  %p2521_p1 = scmp.ne.s32.totalorder %s2519_s4, %s2520_s24  ;;  %p2526_p2 = scmp.lt.s32.totalorder %s2524_s17, %s2520_s24 }
 0x526   : > { %1736 = vrot.lane.b32.xlu0 %v1735_v50, %s2658_s3  ;;  %p2522_p9 = pnand %p2521_p1, %p2894_p13  ;;  %p2527_p7 = por %p2526_p2, %p2525_p12 }
 0x528   : > { %p2523_p10 = pneg %p2522_p9 }
 0x52a   : > { %p2528_p8 = pnand %p2527_p7, %p2523_p10 }
 0x57d   : > { %v1729_v13 = vpop.permute.xlu2 %1728 }
 0x57e   : > { %v1740_v14 = vsel %vm1371_vm4, %v1716_v60, %v1729_v13 }
 0x596   : > { %v1733_v16 = vpop.permute.xlu1 %1732 }
 0x597   : > { %v1742_v17 = vsel %vm1463_vm6, %v1740_v14, %v1733_v16 }
 0x598   : > { %v1737_v18 = vpop.permute.xlu0 %1736 }
 0x599   : > { %v1745_v19 = vsel %vm1743_vm7, %v1742_v17, %v1737_v18 }
 0x59a   : > { %2080 = vmatmul.msk.bf16.vlgmr.msra.gmra.mxu2 %vm1212_vm3, %v1745_v19 }
 0x61d   : > { %v1781_v21 = vpop.f32.mrf.mxu2 }
 0x61e   : > { %v1782_v22 = vadd.f32 %v2277_v20, %v1781_v21 }
 0x620   : > { %1785 = vst.msk [vmem:[%s2958_s7] sm:$0xff] %vm1212_vm3, %v1782_v22 }
 0x621   : > { %2531 = shalt.err (!%p2528_p8)
}
 0x622   : > { %2128 = dma.vmem_to_hbm [thread:$0]  (%p2894_p13), %s1802_s13, 128, %s1804_s29, %s1787_s30  }
 0x625   : > { %v1783_v24 = vpop.f32.mrf.mxu2 }
 0x626 PF: > { %s3387_s20 = sld [smem:[#allocation23_spill]]  ;;  %p2166_p11 = scmp.ge.s32.totalorder %s2638_s27, 2 }
 0x628   : > { %p2154_p4 = pnand %p2166_p11, %p2900_p6 }
 0x62a   : > { %p2155_p0 = pneg %p2154_p4 }
 0x62c   : > { %s1815_s6 = sand.u32 1, %s3387_s20  }
 0x62d   : > { %s1816_s10 = scalar_lea.sflag [#allocation6], %s1815_s6 }
 0x62e   : > { %2593 = dma.done.wait (%p2155_p0), %s1816_s10, 128  }
 0x62f   : > { %2595 = vsyncadd (%p2155_p0), %s1816_s10, 4294967168  ;;  %s32_s27 = sadd.s32 1, %s2638_s27   ;;  %s3389_s17 = sld [smem:[#allocation22_spill]] }
 0x630   : > { %p29_p5 = scmp.ge.s32.totalorder %s32_s27, 6   ;;  %s3390_s16 = sld [smem:[#allocation28_spill]] }
 0x631   : > { %s3391_s2 = sld [smem:[#allocation29_spill]]  ;;  %s3392_s18 = smov %s2606_s19 }
 0x632   : > { %s3393_s19 = smov %s2908_s5  ;;  %s3394_s20 = smov %s2614_s21 }
 0x633   : > { %s3395_s21 = smov %s2618_s22  ;;  %s3396_s22 = smov %s2911_s9 }
 0x634   : > { %s3397_s23 = smov %s2630_s25  ;;  %s3398_s24 = smov %s2634_s26 }
 0x635   :  { %31 = sbr.rel (!%p29_p5) target bundleno = 25 (0x19), region = 153 }
 0x636   : > { %s3399_s25 = smov %s3390_s16 }
 0x637   : > { %s3400_s26 = smov %s3391_s2 }
 0x63a   :  { %1822 = vsyncpa [#allocation5], 1 }
 0x63b   :  { %1824 = vsyncpa [#allocation5 + $0x1], 1 }
 0x63c   :  { %1825 = vsyncpa [#allocation8], 1 }
 0x63d   :  { %1827 = vsyncpa [#allocation8 + $0x1], 1 }
 0x63e   :  { %1828 = vsyncpa [#allocation11], 1 }
 0x63f   :  { %1829 = vsyncpa [#allocation14], 1 }
 0x640   :  { %1830 = vsyncpa [#allocation6], 1 }
 0x641   :  { %1832 = vsyncpa [#allocation6 + $0x1], 1 }

</bundles_post_ra>
